<compile_context>
chip_gen: v7x
topology: tpu7x:2x2x1
jax: 0.10.0
libtpu: 0.0.40
codegen_flags: <defaults>
</compile_context>

<pallas_src>
import functools

import jax
import jax.numpy as jnp
from jax.experimental import pallas as pl
from jax.experimental.pallas import tpu as pltpu


def _round_up(v, m):
    return (v + m - 1) // m * m


def _vmem_limit_bytes():
    # Generation-aware scoped-VMEM budget: ~half of physical VMEM, capped at 64 MiB
    # (v5e/v6e: 128 MiB physical -> 64 MiB; v7x: 64 MiB physical -> 32 MiB).
    try:
        cap = int(pltpu.get_tpu_info().vmem_capacity_bytes)
    except Exception:
        cap = 64 * 1024 * 1024
    return max(32 * 1024 * 1024, min(64 * 1024 * 1024, cap // 2))


def _select_tiles(N, tm, tk):
    n128 = _round_up(N, 128)
    # (8,128) constraint: tm is also the lane (last) dim of the pool_mat block in
    # layer 2, so BOTH tile sizes must be 128-multiples (or the full padded extent).
    tm = max(128, min(_round_up(tm, 128), n128))
    tk = max(128, min(_round_up(tk, 128), n128))
    # make the larger tile a multiple of the smaller so the padded extent is just
    # round_up(N, max(tm, tk)) instead of an lcm blow-up
    if tm >= tk:
        tm = _round_up(tm, tk)
    else:
        tk = _round_up(tk, tm)
    Np = _round_up(N, max(tm, tk))
    # keep >= 2 row tiles when possible so the "parallel" axis splits across v7x's
    # two TensorCores (one extra grid step is negligible on 1-TC v5e/v6e)
    if Np // tm == 1 and tm % 256 == 0 and Np % (tm // 2) == 0:
        tm //= 2
    return tm, tk, Np


def _graphconv_kernel(cmap_ref, msk_ref, a_ref, x_nbr_ref, x_root_ref,
                      w_root_ref, w_nbr_ref, b_ref, h_ref, agg_acc):
    """H = relu(X @ W_root + (A @ X) @ W_nbr + b) for one row tile of nodes.

    grid = (row tiles of A, column tiles of A); the column (contraction) axis is
    innermost/"arbitrary" and accumulates A @ X into an f32 VMEM scratch.
    All-zero adjacency tiles are skipped: their DMA is deduplicated via the
    data-dependent index_map (cmap) and their matmul is gated off (msk).
    """
    i, k = pl.program_id(0), pl.program_id(1)

    @pl.when(k == 0)
    def _init():
        agg_acc[...] = jnp.zeros_like(agg_acc)

    @pl.when(msk_ref[i, k] != 0)
    def _accumulate():
        # bf16 adjacency -> f32 on the VPU (HBM traffic halved; MXU has huge slack)
        a = a_ref[...].astype(jnp.float32)
        agg_acc[...] += jnp.dot(a, x_nbr_ref[...],
                                preferred_element_type=jnp.float32)

    @pl.when(k == pl.num_programs(1) - 1)
    def _emit():
        # two MXU dots instead of a lane-axis concatenate (no relayout / VMEM temp)
        h = (jnp.dot(x_root_ref[...], w_root_ref[...],
                     preferred_element_type=jnp.float32)
             + jnp.dot(agg_acc[...], w_nbr_ref[...],
                       preferred_element_type=jnp.float32)
             + b_ref[...])
        h_ref[...] = jnp.maximum(h, 0.0)


def _graphconv_pool_kernel(cmap_ref, msk_ref, a_ref, h_nbr_ref, h_root_ref,
                           w_root_ref, w_nbr_ref, b_ref, p_ref, pool_ref, agg_acc):
    """Second GraphConv fused with the per-row-tile partial mean-pool:
    pool[i] = P[:, rows_i] @ relu(H1_i @ W_root + (A_i @ H1) @ W_nbr + b),
    so H2 never round-trips through HBM."""
    i, k = pl.program_id(0), pl.program_id(1)

    @pl.when(k == 0)
    def _init():
        agg_acc[...] = jnp.zeros_like(agg_acc)

    @pl.when(msk_ref[i, k] != 0)
    def _accumulate():
        a = a_ref[...].astype(jnp.float32)
        agg_acc[...] += jnp.dot(a, h_nbr_ref[...],
                                preferred_element_type=jnp.float32)

    @pl.when(k == pl.num_programs(1) - 1)
    def _emit():
        h2 = jnp.maximum(
            jnp.dot(h_root_ref[...], w_root_ref[...],
                    preferred_element_type=jnp.float32)
            + jnp.dot(agg_acc[...], w_nbr_ref[...],
                      preferred_element_type=jnp.float32)
            + b_ref[...], 0.0)
        pool_ref[...] = jnp.dot(p_ref[...], h2,
                                preferred_element_type=jnp.float32)[None]


def graph_of_graphs_forward(x, adj, params, pool_mat, edge_index=None, *,
                            tm=512, tk=512):
    """x: (N,F) f32; adj: (N,N) f32 with adj[dst,src]=multiplicity; pool_mat: (B,N) f32.
    edge_index: optional (2,E) int32 [src; dst] used only to build the block-level
    sparsity mask in O(E); if None the mask is derived from adj (O(N^2)).
    Returns (B, d_out) f32."""
    N, F = x.shape
    H = params["w1_root"].shape[1]
    B = pool_mat.shape[0]

    tm, tk, Np = _select_tiles(N, tm, tk)
    grid_m, grid_k = Np // tm, Np // tk

    # zero-pad the node dimension so tiles divide evenly (padded nodes have no edges
    # and zero pool weight, so the result is unchanged)
    if Np != N:
        pad = Np - N
        x = jnp.pad(x, ((0, pad), (0, 0)))
        adj = jnp.pad(adj, ((0, pad), (0, pad)))
        pool_mat = jnp.pad(pool_mat, ((0, 0), (0, pad)))

    # edge multiplicities are small integers -> bf16 is exact; halves A's HBM bytes
    adj_bf16 = adj.astype(jnp.bfloat16)

    # ---- block-level sparsity over (row tile, col tile) blocks of A ----------
    if edge_index is not None:
        src = edge_index[0].astype(jnp.int32)
        dst = edge_index[1].astype(jnp.int32)
        mask = jnp.zeros((grid_m, grid_k), jnp.int32).at[dst // tm, src // tk].max(1)
    else:
        mask = (jnp.abs(adj).reshape(grid_m, tm, grid_k, tk).sum(axis=(1, 3)) > 0
                ).astype(jnp.int32)
    # cmap[i,k]: column tile to fetch at step (i,k) -- k itself when the block is
    # nonzero, else the previous (or first) nonzero column tile of the row so the
    # pipeline's DMA dedup skips the fetch; compute for skipped steps is gated off.
    col_idx = jnp.arange(grid_k, dtype=jnp.int32)[None, :]
    last_nz = jax.lax.cummax(jnp.where(mask > 0, col_idx, -1), axis=1)
    first_nz = jnp.argmax(mask > 0, axis=1).astype(jnp.int32)
    cmap = jnp.where(last_nz < 0, first_nz[:, None], last_nz).astype(jnp.int32)

    w1_root, w1_nbr = params["w1_root"], params["w1_nbr"]
    w2_root, w2_nbr = params["w2_root"], params["w2_nbr"]
    b1 = params["b1"].reshape(1, H)
    b2 = params["b2"].reshape(1, H)

    cparams = pltpu.CompilerParams(
        dimension_semantics=("parallel", "arbitrary"),   # row tiles -> 2 TCs on v7x
        vmem_limit_bytes=_vmem_limit_bytes(),
    )

    # ---- layer 1: H1 = relu(GraphConv(X)) -------------------------------------
    cost1 = pl.CostEstimate(
        flops=int(2 * Np * Np * F + 4 * Np * F * H),
        transcendentals=0,
        bytes_accessed=int(2 * Np * Np + 4 * (2 * Np * F + 2 * F * H + H + Np * H)),
    )
    h1 = pl.pallas_call(
        _graphconv_kernel,
        out_shape=jax.ShapeDtypeStruct((Np, H), jnp.float32),
        grid_spec=pltpu.PrefetchScalarGridSpec(
            num_scalar_prefetch=2,
            grid=(grid_m, grid_k),
            in_specs=[
                pl.BlockSpec((tm, tk), lambda i, k, cm, mk: (i, cm[i, k])),  # A tile
                pl.BlockSpec((tk, F), lambda i, k, cm, mk: (cm[i, k], 0)),   # X cols of A
                pl.BlockSpec((tm, F), lambda i, k, cm, mk: (i, 0)),          # X rows (root)
                pl.BlockSpec((F, H), lambda i, k, cm, mk: (0, 0)),           # W_root
                pl.BlockSpec((F, H), lambda i, k, cm, mk: (0, 0)),           # W_nbr
                pl.BlockSpec((1, H), lambda i, k, cm, mk: (0, 0)),           # bias
            ],
            out_specs=pl.BlockSpec((tm, H), lambda i, k, cm, mk: (i, 0)),
            scratch_shapes=[pltpu.VMEM((tm, F), jnp.float32)],
        ),
        compiler_params=cparams,
        cost_estimate=cost1,
    )(cmap, mask, adj_bf16, x, x, w1_root, w1_nbr, b1)

    # ---- layer 2 fused with per-row-tile mean-pool partials (H2 stays in VMEM) -
    cost2 = pl.CostEstimate(
        flops=int(2 * Np * Np * H + 4 * Np * H * H + 2 * B * Np * H),
        transcendentals=0,
        bytes_accessed=int(2 * Np * Np + 4 * (2 * Np * H + 2 * H * H + H
                                              + B * Np + grid_m * B * H)),
    )
    pooled_parts = pl.pallas_call(
        _graphconv_pool_kernel,
        out_shape=jax.ShapeDtypeStruct((grid_m, B, H), jnp.float32),
        grid_spec=pltpu.PrefetchScalarGridSpec(
            num_scalar_prefetch=2,
            grid=(grid_m, grid_k),
            in_specs=[
                pl.BlockSpec((tm, tk), lambda i, k, cm, mk: (i, cm[i, k])),  # A tile
                pl.BlockSpec((tk, H), lambda i, k, cm, mk: (cm[i, k], 0)),   # H1 cols of A
                pl.BlockSpec((tm, H), lambda i, k, cm, mk: (i, 0)),          # H1 rows (root)
                pl.BlockSpec((H, H), lambda i, k, cm, mk: (0, 0)),           # W_root
                pl.BlockSpec((H, H), lambda i, k, cm, mk: (0, 0)),           # W_nbr
                pl.BlockSpec((1, H), lambda i, k, cm, mk: (0, 0)),           # bias
                pl.BlockSpec((B, tm), lambda i, k, cm, mk: (0, i)),          # pool cols
            ],
            out_specs=pl.BlockSpec((1, B, H), lambda i, k, cm, mk: (i, 0, 0)),
            scratch_shapes=[pltpu.VMEM((tm, H), jnp.float32)],
        ),
        compiler_params=cparams,
        cost_estimate=cost2,
    )(cmap, mask, adj_bf16, h1, h1, w2_root, w2_nbr, b2, pool_mat)

    # tiny epilogue stays in XLA: sum of per-tile pooled partials + final Linear
    hp = jax.lax.Precision.HIGHEST
    pooled = jnp.sum(pooled_parts, axis=0)                               # (B, H)
    return jnp.dot(pooled, params["wfc"], precision=hp) + params["bfc"]


def _reference(x, adj, params, pool_mat):
    hp = jax.lax.Precision.HIGHEST
    h1 = jnp.maximum(
        jnp.dot(x, params["w1_root"], precision=hp)
        + jnp.dot(jnp.dot(adj, x, precision=hp), params["w1_nbr"], precision=hp)
        + params["b1"], 0.0)
    h2 = jnp.maximum(
        jnp.dot(h1, params["w2_root"], precision=hp)
        + jnp.dot(jnp.dot(adj, h1, precision=hp), params["w2_nbr"], precision=hp)
        + params["b2"], 0.0)
    pooled = jnp.dot(pool_mat, h2, precision=hp)
    return jnp.dot(pooled, params["wfc"], precision=hp) + params["bfc"]


if __name__ == "__main__":
    input_dim, hidden_dim, output_dim = 8, 32, 4
    nodes_per_graph, num_graphs = 64, 4          # N=256: 4 rings -> block-diagonal A
    num_nodes = nodes_per_graph * num_graphs

    key = jax.random.PRNGKey(0)
    keys = jax.random.split(key, 10)

    def init(k, shape, fan_in):
        return jax.random.normal(k, shape, jnp.float32) / jnp.sqrt(jnp.float32(fan_in))

    params = {
        "w1_root": init(keys[0], (input_dim, hidden_dim), input_dim),
        "w1_nbr":  init(keys[1], (input_dim, hidden_dim), input_dim),
        "b1":      0.1 * jax.random.normal(keys[2], (hidden_dim,), jnp.float32),
        "w2_root": init(keys[3], (hidden_dim, hidden_dim), hidden_dim),
        "w2_nbr":  init(keys[4], (hidden_dim, hidden_dim), hidden_dim),
        "b2":      0.1 * jax.random.normal(keys[5], (hidden_dim,), jnp.float32),
        "wfc":     init(keys[6], (hidden_dim, output_dim), hidden_dim),
        "bfc":     0.1 * jax.random.normal(keys[7], (output_dim,), jnp.float32),
    }

    x = jax.random.normal(keys[8], (num_nodes, input_dim), jnp.float32)

    # graph structure: `num_graphs` bidirectional ring graphs
    src_list, dst_list = [], []
    for g in range(num_graphs):
        base = g * nodes_per_graph
        for i in range(nodes_per_graph):
            a_, b_ = base + i, base + (i + 1) % nodes_per_graph
            src_list += [a_, b_]
            dst_list += [b_, a_]
    edge_index = jnp.array([src_list, dst_list], dtype=jnp.int32)        # (2, E)

    # dense adjacency: A[dst, src] += 1  (incoming-message aggregation, aggr='add')
    adj = jnp.zeros((num_nodes, num_nodes), jnp.float32).at[
        edge_index[1], edge_index[0]].add(1.0)

    # batch assignment + mean-pool matrix
    batch = jnp.repeat(jnp.arange(num_graphs, dtype=jnp.int32), nodes_per_graph)
    one_hot = (batch[None, :] == jnp.arange(num_graphs)[:, None]).astype(jnp.float32)
    counts = jnp.maximum(one_hot.sum(axis=1, keepdims=True), 1.0)
    pool_mat = one_hot / counts                                          # (B, N)

    ref = _reference(x, adj, params, pool_mat)

    # config 1: production-default tiles (clamped to the 256-node toy graph),
    # block mask derived from the dense adjacency (edge_index=None fallback path)
    fwd = jax.jit(graph_of_graphs_forward)
    out = jax.block_until_ready(fwd(x, adj, params, pool_mat))
    assert out.shape == (num_graphs, output_dim)
    err = float(jnp.max(jnp.abs(out - ref)))
    assert jnp.allclose(out, ref, atol=2e-3, rtol=2e-3), \
        f"default tiles: mismatch vs reference, max abs err {err:.3e}"

    # config 2: explicit 128-tiles -> (2, 2) grid with two all-zero adjacency tiles,
    # exercising the scalar-prefetched block-sparse skip + DMA-dedup path
    fwd128 = jax.jit(functools.partial(graph_of_graphs_forward, tm=128, tk=128))
    out128 = jax.block_until_ready(fwd128(x, adj, params, pool_mat, edge_index))
    err128 = float(jnp.max(jnp.abs(out128 - ref)))
    assert jnp.allclose(out128, ref, atol=2e-3, rtol=2e-3), \
        f"128-tiles: mismatch vs reference, max abs err {err128:.3e}"

    print("KERNEL_OK")
</pallas_src>

<mosaic_0001>
module attributes {stable_mosaic.version = 11 : i64} {
  func.func @_graphconv_pool_kernel(%arg0: i32, %arg1: i32, %arg2: memref<2x1xi32, #tpu.memory_space<smem>>, %arg3: memref<2x1xi32, #tpu.memory_space<smem>>, %arg4: memref<128x256xbf16, #tpu.memory_space<vmem>>, %arg5: memref<256x32xf32, #tpu.memory_space<vmem>>, %arg6: memref<128x32xf32, #tpu.memory_space<vmem>>, %arg7: memref<32x32xf32, #tpu.memory_space<vmem>>, %arg8: memref<32x32xf32, #tpu.memory_space<vmem>>, %arg9: memref<1x32xf32, #tpu.memory_space<vmem>>, %arg10: memref<4x128xf32, #tpu.memory_space<vmem>>, %arg11: memref<1x4x32xf32, #tpu.memory_space<vmem>>, %arg12: memref<128x32xf32, #tpu.memory_space<vmem>>) attributes {dimension_semantics = [#tpu.dimension_semantics<parallel>, #tpu.dimension_semantics<arbitrary>], iteration_bounds = array<i64: 2, 1>, scalar_prefetch = 2 : i64, scratch_operands = 1 : i64, tpu.core_type = #tpu.core_type<tc>, window_params = [{transform_indices = @transform_0, window_bounds = array<i64: 128, 256>}, {transform_indices = @transform_1, window_bounds = array<i64: 256, 32>}, {transform_indices = @transform_2, window_bounds = array<i64: 128, 32>}, {pipeline_mode = #tpu.pipeline_mode<synchronous>, transform_indices = @transform_3, window_bounds = array<i64: 32, 32>}, {pipeline_mode = #tpu.pipeline_mode<synchronous>, transform_indices = @transform_4, window_bounds = array<i64: 32, 32>}, {pipeline_mode = #tpu.pipeline_mode<synchronous>, transform_indices = @transform_5, window_bounds = array<i64: 1, 32>}, {transform_indices = @transform_6, window_bounds = array<i64: 4, 128>}, {transform_indices = @transform_7, window_bounds = array<i64: 1, 4, 32>}]} {
    %c0_i32 = arith.constant 0 : i32
    %0 = arith.cmpi eq, %arg1, %c0_i32 : i32
    %1 = arith.extui %0 : i1 to i32
    %c0_i32_0 = arith.constant 0 : i32
    %2 = arith.cmpi ne, %1, %c0_i32_0 : i32
    scf.if %2 {
      %cst = arith.constant 0.000000e+00 : f32
      %12 = vector.broadcast %cst : f32 to vector<128x32xf32>
      %c0 = arith.constant 0 : index
      %c0_5 = arith.constant 0 : index
      %13 = vector.load %arg12[%c0, %c0_5] : memref<128x32xf32, #tpu.memory_space<vmem>>, vector<128x32xf32>
      tpu.vector_store %arg12[%c0, %c0_5], %12 {strides = array<i32>} : memref<128x32xf32, #tpu.memory_space<vmem>>, vector<128x32xf32>,
    } else {
    }
    %3 = arith.index_cast %arg0 : i32 to index
    %4 = arith.index_cast %arg1 : i32 to index
    %5 = memref.load %arg3[%3, %4] : memref<2x1xi32, #tpu.memory_space<smem>>
    %c0_i32_1 = arith.constant 0 : i32
    %6 = arith.cmpi ne, %5, %c0_i32_1 : i32
    %7 = arith.extui %6 : i1 to i32
    %c0_i32_2 = arith.constant 0 : i32
    %8 = arith.cmpi ne, %7, %c0_i32_2 : i32
    scf.if %8 {
      %c0 = arith.constant 0 : index
      %c0_5 = arith.constant 0 : index
      %12 = vector.load %arg4[%c0, %c0_5] : memref<128x256xbf16, #tpu.memory_space<vmem>>, vector<128x256xbf16>
      %13 = arith.extf %12 : vector<128x256xbf16> to vector<128x256xf32>
      %c0_6 = arith.constant 0 : index
      %c0_7 = arith.constant 0 : index
      %14 = vector.load %arg12[%c0_6, %c0_7] : memref<128x32xf32, #tpu.memory_space<vmem>>, vector<128x32xf32>
      %c0_8 = arith.constant 0 : index
      %c0_9 = arith.constant 0 : index
      %15 = vector.load %arg5[%c0_8, %c0_9] : memref<256x32xf32, #tpu.memory_space<vmem>>, vector<256x32xf32>
      %cst = arith.constant dense<0.000000e+00> : vector<128x32xf32>
      %16 = tpu.matmul %13, %15, %cst {dimension_numbers = #tpu.dot_dimension_numbers<[1], [0], [0], [1], [0, 0, 1, 1], [], []>} : vector<128x256xf32>, vector<256x32xf32>, vector<128x32xf32> -> vector<128x32xf32>
      %17 = arith.addf %14, %16 : vector<128x32xf32>
      %c0_10 = arith.constant 0 : index
      %c0_11 = arith.constant 0 : index
      %18 = vector.load %arg12[%c0_10, %c0_11] : memref<128x32xf32, #tpu.memory_space<vmem>>, vector<128x32xf32>
      tpu.vector_store %arg12[%c0_10, %c0_11], %17 {strides = array<i32>} : memref<128x32xf32, #tpu.memory_space<vmem>>, vector<128x32xf32>,
    } else {
    }
    %c0_i32_3 = arith.constant 0 : i32
    %9 = arith.cmpi eq, %arg1, %c0_i32_3 : i32
    %10 = arith.extui %9 : i1 to i32
    %c0_i32_4 = arith.constant 0 : i32
    %11 = arith.cmpi ne, %10, %c0_i32_4 : i32
    scf.if %11 {
      %c0 = arith.constant 0 : index
      %c0_5 = arith.constant 0 : index
      %12 = vector.load %arg6[%c0, %c0_5] : memref<128x32xf32, #tpu.memory_space<vmem>>, vector<128x32xf32>
      %c0_6 = arith.constant 0 : index
      %c0_7 = arith.constant 0 : index
      %13 = vector.load %arg7[%c0_6, %c0_7] : memref<32x32xf32, #tpu.memory_space<vmem>>, vector<32x32xf32>
      %cst = arith.constant dense<0.000000e+00> : vector<128x32xf32>
      %14 = tpu.matmul %12, %13, %cst {dimension_numbers = #tpu.dot_dimension_numbers<[1], [0], [0], [1], [0, 0, 1, 1], [], []>} : vector<128x32xf32>, vector<32x32xf32>, vector<128x32xf32> -> vector<128x32xf32>
      %c0_8 = arith.constant 0 : index
      %c0_9 = arith.constant 0 : index
      %15 = vector.load %arg12[%c0_8, %c0_9] : memref<128x32xf32, #tpu.memory_space<vmem>>, vector<128x32xf32>
      %c0_10 = arith.constant 0 : index
      %c0_11 = arith.constant 0 : index
      %16 = vector.load %arg8[%c0_10, %c0_11] : memref<32x32xf32, #tpu.memory_space<vmem>>, vector<32x32xf32>
      %cst_12 = arith.constant dense<0.000000e+00> : vector<128x32xf32>
      %17 = tpu.matmul %15, %16, %cst_12 {dimension_numbers = #tpu.dot_dimension_numbers<[1], [0], [0], [1], [0, 0, 1, 1], [], []>} : vector<128x32xf32>, vector<32x32xf32>, vector<128x32xf32> -> vector<128x32xf32>
      %18 = arith.addf %14, %17 : vector<128x32xf32>
      %c0_13 = arith.constant 0 : index
      %c0_14 = arith.constant 0 : index
      %19 = vector.load %arg9[%c0_13, %c0_14] : memref<1x32xf32, #tpu.memory_space<vmem>>, vector<1x32xf32>
      %20 = vector.broadcast %19 : vector<1x32xf32> to vector<128x32xf32>
      %21 = arith.addf %18, %20 : vector<128x32xf32>
      %cst_15 = arith.constant 0.000000e+00 : f32
      %22 = vector.broadcast %cst_15 : f32 to vector<128x32xf32>
      %23 = arith.maximumf %21, %22 : vector<128x32xf32>
      %c0_16 = arith.constant 0 : index
      %c0_17 = arith.constant 0 : index
      %24 = vector.load %arg10[%c0_16, %c0_17] : memref<4x128xf32, #tpu.memory_space<vmem>>, vector<4x128xf32>
      %cst_18 = arith.constant dense<0.000000e+00> : vector<4x32xf32>
      %25 = tpu.matmul %24, %23, %cst_18 {dimension_numbers = #tpu.dot_dimension_numbers<[1], [0], [0], [1], [0, 0, 1, 1], [], []>} : vector<4x128xf32>, vector<128x32xf32>, vector<4x32xf32> -> vector<4x32xf32>
      %26 = vector.shape_cast %25 : vector<4x32xf32> to vector<1x4x32xf32>
      %c0_19 = arith.constant 0 : index
      %c0_20 = arith.constant 0 : index
      %c0_21 = arith.constant 0 : index
      %27 = vector.load %arg11[%c0_19, %c0_20, %c0_21] : memref<1x4x32xf32, #tpu.memory_space<vmem>>, vector<1x4x32xf32>
      tpu.vector_store %arg11[%c0_19, %c0_20, %c0_21], %26 {strides = array<i32>} : memref<1x4x32xf32, #tpu.memory_space<vmem>>, vector<1x4x32xf32>,
    } else {
    }
    return
  }
  func.func @transform_0(%arg0: i32, %arg1: i32, %arg2: memref<2x1xi32, #tpu.memory_space<smem>>, %arg3: memref<2x1xi32, #tpu.memory_space<smem>>) -> (i32, i32) {
    %0 = arith.index_cast %arg0 : i32 to index
    %1 = arith.index_cast %arg1 : i32 to index
    %2 = memref.load %arg2[%0, %1] : memref<2x1xi32, #tpu.memory_space<smem>>
    %c0_i32 = arith.constant 0 : i32
    return %arg0, %2 : i32, i32
  }
  func.func @transform_1(%arg0: i32, %arg1: i32, %arg2: memref<2x1xi32, #tpu.memory_space<smem>>, %arg3: memref<2x1xi32, #tpu.memory_space<smem>>) -> (i32, i32) {
    %0 = arith.index_cast %arg0 : i32 to index
    %1 = arith.index_cast %arg1 : i32 to index
    %2 = memref.load %arg2[%0, %1] : memref<2x1xi32, #tpu.memory_space<smem>>
    %c0_i32 = arith.constant 0 : i32
    %c0_i32_0 = arith.constant 0 : i32
    return %2, %c0_i32 : i32, i32
  }
  func.func @transform_2(%arg0: i32, %arg1: i32, %arg2: memref<2x1xi32, #tpu.memory_space<smem>>, %arg3: memref<2x1xi32, #tpu.memory_space<smem>>) -> (i32, i32) {
    %c0_i32 = arith.constant 0 : i32
    %c0_i32_0 = arith.constant 0 : i32
    return %arg0, %c0_i32 : i32, i32
  }
  func.func @transform_3(%arg0: i32, %arg1: i32, %arg2: memref<2x1xi32, #tpu.memory_space<smem>>, %arg3: memref<2x1xi32, #tpu.memory_space<smem>>) -> (i32, i32) {
    %c0_i32 = arith.constant 0 : i32
    %c0_i32_0 = arith.constant 0 : i32
    %c0_i32_1 = arith.constant 0 : i32
    return %c0_i32, %c0_i32_0 : i32, i32
  }
  func.func @transform_4(%arg0: i32, %arg1: i32, %arg2: memref<2x1xi32, #tpu.memory_space<smem>>, %arg3: memref<2x1xi32, #tpu.memory_space<smem>>) -> (i32, i32) {
    %c0_i32 = arith.constant 0 : i32
    %c0_i32_0 = arith.constant 0 : i32
    %c0_i32_1 = arith.constant 0 : i32
    return %c0_i32, %c0_i32_0 : i32, i32
  }
  func.func @transform_5(%arg0: i32, %arg1: i32, %arg2: memref<2x1xi32, #tpu.memory_space<smem>>, %arg3: memref<2x1xi32, #tpu.memory_space<smem>>) -> (i32, i32) {
    %c0_i32 = arith.constant 0 : i32
    %c0_i32_0 = arith.constant 0 : i32
    %c0_i32_1 = arith.constant 0 : i32
    return %c0_i32, %c0_i32_0 : i32, i32
  }
  func.func @transform_6(%arg0: i32, %arg1: i32, %arg2: memref<2x1xi32, #tpu.memory_space<smem>>, %arg3: memref<2x1xi32, #tpu.memory_space<smem>>) -> (i32, i32) {
    %c0_i32 = arith.constant 0 : i32
    %c0_i32_0 = arith.constant 0 : i32
    return %c0_i32, %arg0 : i32, i32
  }
  func.func @transform_7(%arg0: i32, %arg1: i32, %arg2: memref<2x1xi32, #tpu.memory_space<smem>>, %arg3: memref<2x1xi32, #tpu.memory_space<smem>>) -> (i32, i32, i32) {
    %c0_i32 = arith.constant 0 : i32
    %c0_i32_0 = arith.constant 0 : i32
    %c0_i32_1 = arith.constant 0 : i32
    return %arg0, %c0_i32, %c0_i32_0 : i32, i32, i32
  }
}

module attributes {stable_mosaic.version = 11 : i64} {
  func.func @_graphconv_kernel(%arg0: i32, %arg1: i32, %arg2: memref<2x1xi32, #tpu.memory_space<smem>>, %arg3: memref<2x1xi32, #tpu.memory_space<smem>>, %arg4: memref<128x256xbf16, #tpu.memory_space<vmem>>, %arg5: memref<256x8xf32, #tpu.memory_space<vmem>>, %arg6: memref<128x8xf32, #tpu.memory_space<vmem>>, %arg7: memref<8x32xf32, #tpu.memory_space<vmem>>, %arg8: memref<8x32xf32, #tpu.memory_space<vmem>>, %arg9: memref<1x32xf32, #tpu.memory_space<vmem>>, %arg10: memref<128x32xf32, #tpu.memory_space<vmem>>, %arg11: memref<128x8xf32, #tpu.memory_space<vmem>>) attributes {dimension_semantics = [#tpu.dimension_semantics<parallel>, #tpu.dimension_semantics<arbitrary>], iteration_bounds = array<i64: 2, 1>, scalar_prefetch = 2 : i64, scratch_operands = 1 : i64, tpu.core_type = #tpu.core_type<tc>, window_params = [{transform_indices = @transform_0, window_bounds = array<i64: 128, 256>}, {transform_indices = @transform_1, window_bounds = array<i64: 256, 8>}, {transform_indices = @transform_2, window_bounds = array<i64: 128, 8>}, {pipeline_mode = #tpu.pipeline_mode<synchronous>, transform_indices = @transform_3, window_bounds = array<i64: 8, 32>}, {pipeline_mode = #tpu.pipeline_mode<synchronous>, transform_indices = @transform_4, window_bounds = array<i64: 8, 32>}, {pipeline_mode = #tpu.pipeline_mode<synchronous>, transform_indices = @transform_5, window_bounds = array<i64: 1, 32>}, {transform_indices = @transform_6, window_bounds = array<i64: 128, 32>}]} {
    %c0_i32 = arith.constant 0 : i32
    %0 = arith.cmpi eq, %arg1, %c0_i32 : i32
    %1 = arith.extui %0 : i1 to i32
    %c0_i32_0 = arith.constant 0 : i32
    %2 = arith.cmpi ne, %1, %c0_i32_0 : i32
    scf.if %2 {
      %cst = arith.constant 0.000000e+00 : f32
      %12 = vector.broadcast %cst : f32 to vector<128x8xf32>
      %c0 = arith.constant 0 : index
      %c0_5 = arith.constant 0 : index
      %13 = vector.load %arg11[%c0, %c0_5] : memref<128x8xf32, #tpu.memory_space<vmem>>, vector<128x8xf32>
      tpu.vector_store %arg11[%c0, %c0_5], %12 {strides = array<i32>} : memref<128x8xf32, #tpu.memory_space<vmem>>, vector<128x8xf32>,
    } else {
    }
    %3 = arith.index_cast %arg0 : i32 to index
    %4 = arith.index_cast %arg1 : i32 to index
    %5 = memref.load %arg3[%3, %4] : memref<2x1xi32, #tpu.memory_space<smem>>
    %c0_i32_1 = arith.constant 0 : i32
    %6 = arith.cmpi ne, %5, %c0_i32_1 : i32
    %7 = arith.extui %6 : i1 to i32
    %c0_i32_2 = arith.constant 0 : i32
    %8 = arith.cmpi ne, %7, %c0_i32_2 : i32
    scf.if %8 {
      %c0 = arith.constant 0 : index
      %c0_5 = arith.constant 0 : index
      %12 = vector.load %arg4[%c0, %c0_5] : memref<128x256xbf16, #tpu.memory_space<vmem>>, vector<128x256xbf16>
      %13 = arith.extf %12 : vector<128x256xbf16> to vector<128x256xf32>
      %c0_6 = arith.constant 0 : index
      %c0_7 = arith.constant 0 : index
      %14 = vector.load %arg11[%c0_6, %c0_7] : memref<128x8xf32, #tpu.memory_space<vmem>>, vector<128x8xf32>
      %c0_8 = arith.constant 0 : index
      %c0_9 = arith.constant 0 : index
      %15 = vector.load %arg5[%c0_8, %c0_9] : memref<256x8xf32, #tpu.memory_space<vmem>>, vector<256x8xf32>
      %cst = arith.constant dense<0.000000e+00> : vector<128x8xf32>
      %16 = tpu.matmul %13, %15, %cst {dimension_numbers = #tpu.dot_dimension_numbers<[1], [0], [0], [1], [0, 0, 1, 1], [], []>} : vector<128x256xf32>, vector<256x8xf32>, vector<128x8xf32> -> vector<128x8xf32>
      %17 = arith.addf %14, %16 : vector<128x8xf32>
      %c0_10 = arith.constant 0 : index
      %c0_11 = arith.constant 0 : index
      %18 = vector.load %arg11[%c0_10, %c0_11] : memref<128x8xf32, #tpu.memory_space<vmem>>, vector<128x8xf32>
      tpu.vector_store %arg11[%c0_10, %c0_11], %17 {strides = array<i32>} : memref<128x8xf32, #tpu.memory_space<vmem>>, vector<128x8xf32>,
    } else {
    }
    %c0_i32_3 = arith.constant 0 : i32
    %9 = arith.cmpi eq, %arg1, %c0_i32_3 : i32
    %10 = arith.extui %9 : i1 to i32
    %c0_i32_4 = arith.constant 0 : i32
    %11 = arith.cmpi ne, %10, %c0_i32_4 : i32
    scf.if %11 {
      %c0 = arith.constant 0 : index
      %c0_5 = arith.constant 0 : index
      %12 = vector.load %arg6[%c0, %c0_5] : memref<128x8xf32, #tpu.memory_space<vmem>>, vector<128x8xf32>
      %c0_6 = arith.constant 0 : index
      %c0_7 = arith.constant 0 : index
      %13 = vector.load %arg7[%c0_6, %c0_7] : memref<8x32xf32, #tpu.memory_space<vmem>>, vector<8x32xf32>
      %cst = arith.constant dense<0.000000e+00> : vector<128x32xf32>
      %14 = tpu.matmul %12, %13, %cst {dimension_numbers = #tpu.dot_dimension_numbers<[1], [0], [0], [1], [0, 0, 1, 1], [], []>} : vector<128x8xf32>, vector<8x32xf32>, vector<128x32xf32> -> vector<128x32xf32>
      %c0_8 = arith.constant 0 : index
      %c0_9 = arith.constant 0 : index
      %15 = vector.load %arg11[%c0_8, %c0_9] : memref<128x8xf32, #tpu.memory_space<vmem>>, vector<128x8xf32>
      %c0_10 = arith.constant 0 : index
      %c0_11 = arith.constant 0 : index
      %16 = vector.load %arg8[%c0_10, %c0_11] : memref<8x32xf32, #tpu.memory_space<vmem>>, vector<8x32xf32>
      %cst_12 = arith.constant dense<0.000000e+00> : vector<128x32xf32>
      %17 = tpu.matmul %15, %16, %cst_12 {dimension_numbers = #tpu.dot_dimension_numbers<[1], [0], [0], [1], [0, 0, 1, 1], [], []>} : vector<128x8xf32>, vector<8x32xf32>, vector<128x32xf32> -> vector<128x32xf32>
      %18 = arith.addf %14, %17 : vector<128x32xf32>
      %c0_13 = arith.constant 0 : index
      %c0_14 = arith.constant 0 : index
      %19 = vector.load %arg9[%c0_13, %c0_14] : memref<1x32xf32, #tpu.memory_space<vmem>>, vector<1x32xf32>
      %20 = vector.broadcast %19 : vector<1x32xf32> to vector<128x32xf32>
      %21 = arith.addf %18, %20 : vector<128x32xf32>
      %cst_15 = arith.constant 0.000000e+00 : f32
      %22 = vector.broadcast %cst_15 : f32 to vector<128x32xf32>
      %23 = arith.maximumf %21, %22 : vector<128x32xf32>
      %c0_16 = arith.constant 0 : index
      %c0_17 = arith.constant 0 : index
      %24 = vector.load %arg10[%c0_16, %c0_17] : memref<128x32xf32, #tpu.memory_space<vmem>>, vector<128x32xf32>
      tpu.vector_store %arg10[%c0_16, %c0_17], %23 {strides = array<i32>} : memref<128x32xf32, #tpu.memory_space<vmem>>, vector<128x32xf32>,
    } else {
    }
    return
  }
  func.func @transform_0(%arg0: i32, %arg1: i32, %arg2: memref<2x1xi32, #tpu.memory_space<smem>>, %arg3: memref<2x1xi32, #tpu.memory_space<smem>>) -> (i32, i32) {
    %0 = arith.index_cast %arg0 : i32 to index
    %1 = arith.index_cast %arg1 : i32 to index
    %2 = memref.load %arg2[%0, %1] : memref<2x1xi32, #tpu.memory_space<smem>>
    %c0_i32 = arith.constant 0 : i32
    return %arg0, %2 : i32, i32
  }
  func.func @transform_1(%arg0: i32, %arg1: i32, %arg2: memref<2x1xi32, #tpu.memory_space<smem>>, %arg3: memref<2x1xi32, #tpu.memory_space<smem>>) -> (i32, i32) {
    %0 = arith.index_cast %arg0 : i32 to index
    %1 = arith.index_cast %arg1 : i32 to index
    %2 = memref.load %arg2[%0, %1] : memref<2x1xi32, #tpu.memory_space<smem>>
    %c0_i32 = arith.constant 0 : i32
    %c0_i32_0 = arith.constant 0 : i32
    return %2, %c0_i32 : i32, i32
  }
  func.func @transform_2(%arg0: i32, %arg1: i32, %arg2: memref<2x1xi32, #tpu.memory_space<smem>>, %arg3: memref<2x1xi32, #tpu.memory_space<smem>>) -> (i32, i32) {
    %c0_i32 = arith.constant 0 : i32
    %c0_i32_0 = arith.constant 0 : i32
    return %arg0, %c0_i32 : i32, i32
  }
  func.func @transform_3(%arg0: i32, %arg1: i32, %arg2: memref<2x1xi32, #tpu.memory_space<smem>>, %arg3: memref<2x1xi32, #tpu.memory_space<smem>>) -> (i32, i32) {
    %c0_i32 = arith.constant 0 : i32
    %c0_i32_0 = arith.constant 0 : i32
    %c0_i32_1 = arith.constant 0 : i32
    return %c0_i32, %c0_i32_0 : i32, i32
  }
  func.func @transform_4(%arg0: i32, %arg1: i32, %arg2: memref<2x1xi32, #tpu.memory_space<smem>>, %arg3: memref<2x1xi32, #tpu.memory_space<smem>>) -> (i32, i32) {
    %c0_i32 = arith.constant 0 : i32
    %c0_i32_0 = arith.constant 0 : i32
    %c0_i32_1 = arith.constant 0 : i32
    return %c0_i32, %c0_i32_0 : i32, i32
  }
  func.func @transform_5(%arg0: i32, %arg1: i32, %arg2: memref<2x1xi32, #tpu.memory_space<smem>>, %arg3: memref<2x1xi32, #tpu.memory_space<smem>>) -> (i32, i32) {
    %c0_i32 = arith.constant 0 : i32
    %c0_i32_0 = arith.constant 0 : i32
    %c0_i32_1 = arith.constant 0 : i32
    return %c0_i32, %c0_i32_0 : i32, i32
  }
  func.func @transform_6(%arg0: i32, %arg1: i32, %arg2: memref<2x1xi32, #tpu.memory_space<smem>>, %arg3: memref<2x1xi32, #tpu.memory_space<smem>>) -> (i32, i32) {
    %c0_i32 = arith.constant 0 : i32
    %c0_i32_0 = arith.constant 0 : i32
    return %arg0, %c0_i32 : i32, i32
  }
}

</mosaic_0001>

<bundles_post_ra>
// kernel: graph_of_graphs_forward.2
= control target key start
LH: loop header
LB: loop body
LE: loop exit
PB: predicated region body
PF: predicated region fallthrough
CT: control target
= control target key end

     0   :  { %s2002_s0 = inlined_call_operand.vmem [shape: s32[2,1], index: 0, kind: input, shape index: {}]   ;;  %s2003_s2 = inlined_call_operand.vmem [shape: bf16[256,256], index: 2, kind: input, shape index: {}]   ;;  %s2004_s3 = inlined_call_operand.vmem [shape: f32[256,8], index: 3, kind: input, shape index: {}, may-alias: {3,4}]   ;;  %s2005_s4 = inlined_call_operand.vmem [shape: f32[256,8], index: 4, kind: input, shape index: {}, may-alias: {3,4}]   ;;  %s2006_s5 = inlined_call_operand.vmem [shape: f32[8,32], index: 5, kind: input, shape index: {}]   ;;  %s2007_s6 = inlined_call_operand.vmem [shape: f32[8,32], index: 6, kind: input, shape index: {}]   ;;  %s2008_s7 = inlined_call_operand.vmem [shape: f32[1,32], index: 7, kind: input, shape index: {}]   ;;  %s2009_s8 = inlined_call_operand.vmem [shape: f32[256,32], index: 8, kind: output, shape index: {}]   ;;  %s2010_s1 = inlined_call_operand.vmem [shape: s32[2,1], index: 1, kind: input, shape index: {}]  }
   0x1   :  { %s13_s29 = sshll.u32 %s2002_s0, 4  ;;  %s17_s10 = sshll.u32 %s2010_s1, 4  ;;  %s14_s29 = int_to_ptr.vmem [resolvable:$true] %s13_s29  ;;  %s18_s10 = int_to_ptr.vmem [resolvable:$true] %s17_s10 }
   0x2   :  { %s1651_s11 = scalar_lea.vmem %s14_s29, 32  ;;  %p1656_p1 = scmp.lt.s32.totalorder %s14_s29, %s14_s29 }
   0x3   :  { %p1652_p0 = scmp.ne.s32.totalorder %s14_s29, %s1651_s11  ;;  %p1657_p2 = scmp.lt.s32.totalorder %s1651_s11, %s1651_s11 }
   0x5   :  { %p1658_p3 = por %p1657_p2, %p1656_p1 }
   0x7   :  { %p1659_p4 = pnand %p1658_p3, %p1652_p0 }
   0x9   :  { %1662 = shalt.err (!%p1659_p4)  }
   0xa   :  { %s1701_s12 = smov [#allocation4]   ;;  %s1663_s13 = scalar_lea.vmem %s18_s10, 32 }
   0xb   :  { %16 = dma.vmem_to_smem %s14_s29, 32, %s1701_s12, [#allocation3] }
   0xc   :  { %p1664_p5 = scmp.ne.s32.totalorder %s18_s10, %s1663_s13  ;;  %p1668_p6 = scmp.lt.s32.totalorder %s18_s10, %s18_s10 }
   0xd   :  { %p1669_p7 = scmp.lt.s32.totalorder %s1663_s13, %s1663_s13 }
   0xf   :  { %p1670_p8 = por %p1669_p7, %p1668_p6 }
  0x11   :  { %p1671_p9 = pnand %p1670_p8, %p1664_p5 }
  0x13   :  { %1674 = shalt.err (!%p1671_p9)  }
  0x14   :  { %s1702_s0 = smov [#allocation5]  }
  0x15   :  { %20 = dma.vmem_to_smem %s18_s10, 32, %s1702_s0, [#allocation3] }
  0x16   :  { %1687 = dma.done.wait [#allocation3], 64 }
  0x17   :  { %1688 = vsyncadd [#allocation3], 4294967232 }
  0x18   :  { %22 = sfence }
  0x19   :  { %s1755_s1 = smov 0   ;;  %s1757_s14 = smov 0  }
  0x1a   :  { %s1759_s15 = smov 0  }
  0x1b LB: > { %s40_s16 = sadd.s32 1, %s1695_s14  ;;  %p1344_p10 = scmp.ge.s32.totalorder %s1699_s15, 1  ;;  %s1699_s15 = sphi %s1759_s15, %s28_s15   ;;  %s1695_s14 = sphi %s1757_s14, %s2013_s14   ;;  %s1691_s1 = sphi %s1755_s1, %s2012_s1  }
  0x1c   : > { %p42_p11 = scmp.ge.s32.totalorder %s40_s16, 2  ;;  %p331_p12 = scmp.lt.s32.totalorder %s1699_s15, 3 }
  0x1e   : > { %s2015_s16 = smov (%p42_p11, %s40_s16), 0  ;;  %p332_p13 = pnand %p1344_p10, %p331_p12 }
  0x1f   : > { %s1345_s17 = sshll.u32 (!%p332_p13), %s1691_s1, 7  ;;  %s1346_s18 = sshll.u32 (!%p332_p13), %s1691_s1, 4  ;;  %vm458_vm0 = vcmask (!%p332_p13), 64512   ;;  %v1703_v0 = vmov (!%p332_p13), 0.0  }
  0x20   : > { %335 = sbr.rel (%p332_p13) target bundleno = 581 (0x245), region = 44  ;;  %s1777_s19 = sld [smem:[#allocation4 + %s1345_s17]] (!%p332_p13)  ;;  %459 = vst.msk [vmem:[#allocation2] sm:$0xff] (!%p332_p13), %vm458_vm0, %v1703_v0  ;;  %460 = vst.msk [vmem:[#allocation2 + $0x8] sm:$0xff] (!%p332_p13), %vm458_vm0, %v1703_v0 }
  0x21   : > { %p1779_p0 = scmp.lt.s32.totalorder (!%p332_p13), %s1346_s18, 31  ;;  %461 = vst.msk [vmem:[#allocation2 + $0x10] sm:$0xff] (!%p332_p13), %vm458_vm0, %v1703_v0  ;;  %462 = vst.msk [vmem:[#allocation2 + $0x18] sm:$0xff] (!%p332_p13), %vm458_vm0, %v1703_v0  ;;  %s427_s21 = sld [smem:[#allocation4 + %s1345_s17]] (!%p332_p13) }
  0x22   : > { %463 = vst.msk [vmem:[#allocation2 + $0x20] sm:$0xff] (!%p332_p13), %vm458_vm0, %v1703_v0  ;;  %464 = vst.msk [vmem:[#allocation2 + $0x28] sm:$0xff] (!%p332_p13), %vm458_vm0, %v1703_v0  ;;  %s482_s22 = sld [smem:[#allocation5 + %s1345_s17]] (!%p332_p13) }
  0x23   : > { %465 = vst.msk [vmem:[#allocation2 + $0x30] sm:$0xff] (!%p332_p13), %vm458_vm0, %v1703_v0  ;;  %466 = vst.msk [vmem:[#allocation2 + $0x38] sm:$0xff] (!%p332_p13), %vm458_vm0, %v1703_v0 }
  0x24   : > { %467 = vst.msk [vmem:[#allocation2 + $0x40] sm:$0xff] (!%p332_p13), %vm458_vm0, %v1703_v0  ;;  %468 = vst.msk [vmem:[#allocation2 + $0x48] sm:$0xff] (!%p332_p13), %vm458_vm0, %v1703_v0 }
  0x25   : > { %469 = vst.msk [vmem:[#allocation2 + $0x50] sm:$0xff] (!%p332_p13), %vm458_vm0, %v1703_v0  ;;  %470 = vst.msk [vmem:[#allocation2 + $0x58] sm:$0xff] (!%p332_p13), %vm458_vm0, %v1703_v0 }
  0x26   : > { %471 = vst.msk [vmem:[#allocation2 + $0x60] sm:$0xff] (!%p332_p13), %vm458_vm0, %v1703_v0  ;;  %472 = vst.msk [vmem:[#allocation2 + $0x68] sm:$0xff] (!%p332_p13), %vm458_vm0, %v1703_v0  ;;  %s1347_s30 = sshll.u32 (!%p332_p13), %s1777_s19, 1 }
  0x27   : > { %473 = vst.msk [vmem:[#allocation2 + $0x70] sm:$0xff] %vm458_vm0, %v1703_v0  ;;  %474 = vst.msk [vmem:[#allocation2 + $0x78] sm:$0xff] %vm458_vm0, %v1703_v0  ;;  %s2017_s18 = smov (!%p1779_p0, %s1346_s18), 31  ;;  %p404_p1 = scmp.lt.s32.totalorder %s1347_s30, 1 }
  0x28   : > { %s1354_s23 = sshll.u32 %s2017_s18, 3  ;;  %s1351_s9 = sshll.u32 %s427_s21, 5 }
  0x29   : > { %s1804_s26 = scalar_lea.vmem %s2005_s4, %s1354_s23  ;;  %s1809_s29 = scalar_lea.vmem %s2009_s8, %s1354_s23 }
  0x2a   : > { %s1348_s10 = sshll.u32 %s2017_s18, 1  ;;  %p429_p2 = scmp.lt.s32.totalorder %s1351_s9, 31 }
  0x2b   : > { %s2019_s30 = smov (!%p404_p1, %s1347_s30), 1  ;;  %p1358_p3 = scmp.eq.s32.totalorder %s482_s22, 0 }
  0x2c   : > { %s2021_s9 = smov (!%p429_p2, %s1351_s9), 31  ;;  %s407_s11 = sadd.s32 %s1348_s10, %s2019_s30 }
  0x2d   : > { %s1349_s12 = sshll.u32 %s407_s11, 2  ;;  %s1352_s13 = sshll.u32 %s2021_s9, 3 }
  0x2e   : > { %s1815_s17 = scalar_lea.vmem %s2003_s2, %s1349_s12  ;;  %s1820_s23 = scalar_lea.vmem %s2004_s3, %s1352_s13 }
  0x2f   : > { %486 = sbr.rel (%p1358_p3) target bundleno = 328 (0x148), region = 52  ;;  %v567_v1 = vld [vmem:[%s1820_s23 + $0x80] sm:$0xff] (!%p1358_p3)  ;;  %v568_v2 = vld [vmem:[%s1820_s23 + $0x88] sm:$0xff] (!%p1358_p3)  ;;  %v569_v6 = vld [vmem:[%s1820_s23 + $0x90] sm:$0xff] (!%p1358_p3) }
  0x30   : > { %v551_v3 = vld [vmem:[%s1820_s23] sm:$0xff] (!%p1358_p3)  ;;  %v1560_v4 = vpack.c.bf16 (!%p1358_p3), %v568_v2, %v567_v1  ;;  %v552_v5 = vld [vmem:[%s1820_s23 + $0x8] sm:$0xff] (!%p1358_p3)  ;;  %v570_v7 = vld [vmem:[%s1820_s23 + $0x98] sm:$0xff] (!%p1358_p3) }
  0x31   : > { %v1562_v8 = vpack.c.bf16 (!%p1358_p3), %v552_v5, %v551_v3  ;;  %v1564_v9 = vpack.c.bf16 (!%p1358_p3), %v570_v7, %v569_v6  ;;  %v553_v10 = vld [vmem:[%s1820_s23 + $0x10] sm:$0xff] (!%p1358_p3)  ;;  %v554_v11 = vld [vmem:[%s1820_s23 + $0x18] sm:$0xff] (!%p1358_p3)  ;;  %v571_v12 = vld [vmem:[%s1820_s23 + $0xa0] sm:$0xff] (!%p1358_p3) }
  0x32   : > { %1561 = vmatprep.subr.bf16.mxu0 (!%p1358_p3), %v1560_v4  ;;  %1592 = vmatprep.subr.bf16.mxu1 (!%p1358_p3), %v1560_v4  ;;  %v572_v13 = vld [vmem:[%s1820_s23 + $0xa8] sm:$0xff] (!%p1358_p3)  ;;  %v1566_v14 = vpack.c.bf16 (!%p1358_p3), %v554_v11, %v553_v10  ;;  %v555_v16 = vld [vmem:[%s1820_s23 + $0x20] sm:$0xff] (!%p1358_p3)  ;;  %v573_v18 = vld [vmem:[%s1820_s23 + $0xb0] sm:$0xff] (!%p1358_p3) }
  0x33   : > { %1563 = vmatpush3.bf16.msra.mxu0 (!%p1358_p3), %v1562_v8  ;;  %1600 = vmatpush3.bf16.msra.mxu1 (!%p1358_p3), %v1562_v8  ;;  %v1568_v15 = vpack.c.bf16 (!%p1358_p3), %v572_v13, %v571_v12  ;;  %v556_v17 = vld [vmem:[%s1820_s23 + $0x28] sm:$0xff] (!%p1358_p3)  ;;  %v574_v19 = vld [vmem:[%s1820_s23 + $0xb8] sm:$0xff] (!%p1358_p3)  ;;  %v557_v22 = vld [vmem:[%s1820_s23 + $0x30] sm:$0xff] (!%p1358_p3) }
  0x34   : > { %1565 = vmatprep.subr.bf16.mxu0 (!%p1358_p3), %v1564_v9  ;;  %1593 = vmatprep.subr.bf16.mxu1 (!%p1358_p3), %v1564_v9  ;;  %v1570_v20 = vpack.c.bf16 (!%p1358_p3), %v556_v17, %v555_v16  ;;  %v1572_v21 = vpack.c.bf16 (!%p1358_p3), %v574_v19, %v573_v18  ;;  %v558_v23 = vld [vmem:[%s1820_s23 + $0x38] sm:$0xff] (!%p1358_p3)  ;;  %v575_v24 = vld [vmem:[%s1820_s23 + $0xc0] sm:$0xff] (!%p1358_p3)  ;;  %v576_v25 = vld [vmem:[%s1820_s23 + $0xc8] sm:$0xff] (!%p1358_p3) }
  0x35   : > { %v487_v26 = vld [vmem:[%s1815_s17] sm:$0xff] (!%p1358_p3)  ;;  %v1574_v29 = vpack.c.bf16 (!%p1358_p3), %v558_v23, %v557_v22  ;;  %v1576_v31 = vpack.c.bf16 (!%p1358_p3), %v576_v25, %v575_v24  ;;  %v560_v33 = vld [vmem:[%s1820_s23 + $0x48] sm:$0xff] (!%p1358_p3)  ;;  %v577_v34 = vld [vmem:[%s1820_s23 + $0xd0] sm:$0xff] (!%p1358_p3) }
  0x36   : > { %v504_v27 = vunpack.c.h.bf16 %v487_v26  ;;  %v495_v28 = vld [vmem:[%s1815_s17 + $0x40] sm:$0xff]  ;;  %v578_v35 = vld [vmem:[%s1820_s23 + $0xd8] sm:$0xff]  ;;  %v561_v38 = vld [vmem:[%s1820_s23 + $0x50] sm:$0xff]  ;;  %v503_v55 = vunpack.c.l.bf16 %v487_v26 }
  0x37   : > { %1567 = vmatpush3.bf16.msra.mxu0 %v1566_v14  ;;  %1601 = vmatpush3.bf16.msra.mxu1 %v1566_v14  ;;  %v520_v30 = vunpack.c.h.bf16 %v495_v28  ;;  %v559_v32 = vld [vmem:[%s1820_s23 + $0x40] sm:$0xff]  ;;  %v1580_v37 = vpack.c.bf16 %v578_v35, %v577_v34  ;;  %v562_v39 = vld [vmem:[%s1820_s23 + $0x58] sm:$0xff]  ;;  %v580_v41 = vld [vmem:[%s1820_s23 + $0xe8] sm:$0xff]  ;;  %v519_v56 = vunpack.c.l.bf16 %v495_v28 }
  0x38   : > { %1569 = vmatprep.subr.bf16.mxu0 %v1568_v15  ;;  %1594 = vmatprep.subr.bf16.mxu1 %v1568_v15  ;;  %v1578_v36 = vpack.c.bf16 %v560_v33, %v559_v32  ;;  %v579_v40 = vld [vmem:[%s1820_s23 + $0xe0] sm:$0xff]  ;;  %v1582_v42 = vpack.c.bf16 %v562_v39, %v561_v38  ;;  %v564_v45 = vld [vmem:[%s1820_s23 + $0x68] sm:$0xff]  ;;  %v581_v46 = vld [vmem:[%s1820_s23 + $0xf0] sm:$0xff] }
  0x39   : > { %647 = vmatprep.mubr.f32.mxu0 %v504_v27  ;;  %687 = vmatprep.mubr.f32.mxu1 %v520_v30  ;;  %v1584_v43 = vpack.c.bf16 %v580_v41, %v579_v40  ;;  %v563_v44 = vld [vmem:[%s1820_s23 + $0x60] sm:$0xff]  ;;  %v582_v47 = vld [vmem:[%s1820_s23 + $0xf8] sm:$0xff]  ;;  %v565_v50 = vld [vmem:[%s1820_s23 + $0x70] sm:$0xff] }
  0x3a   : > { %v1586_v48 = vpack.c.bf16 %v564_v45, %v563_v44  ;;  %v1588_v49 = vpack.c.bf16 %v582_v47, %v581_v46  ;;  %v566_v51 = vld [vmem:[%s1820_s23 + $0x78] sm:$0xff]  ;;  %v488_v53 = vld [vmem:[%s1815_s17 + $0x8] sm:$0xff]  ;;  %v489_v59 = vld [vmem:[%s1815_s17 + $0x10] sm:$0xff] }
  0x3b   : > { %1571 = vmatpush3.bf16.msra.mxu0 %v1570_v20  ;;  %1602 = vmatpush3.bf16.msra.mxu1 %v1570_v20  ;;  %v1590_v52 = vpack.c.bf16 %v566_v51, %v565_v50  ;;  %v496_v54 = vld [vmem:[%s1815_s17 + $0x48] sm:$0xff]  ;;  %v506_v57 = vunpack.c.h.bf16 %v488_v53  ;;  %v497_v60 = vld [vmem:[%s1815_s17 + $0x50] sm:$0xff]  ;;  %v505_v61 = vunpack.c.l.bf16 %v488_v53  ;;  %v508_v63 = vunpack.c.h.bf16 %v489_v59  ;;  %v490_v1 = vld [vmem:[%s1815_s17 + $0x18] sm:$0xff] }
  0x3c   : > { %1573 = vmatprep.subr.bf16.mxu0 %v1572_v21  ;;  %1595 = vmatprep.subr.bf16.mxu1 %v1572_v21  ;;  %v522_v58 = vunpack.c.h.bf16 %v496_v54  ;;  %v521_v62 = vunpack.c.l.bf16 %v496_v54  ;;  %v524_v0 = vunpack.c.h.bf16 %v497_v60  ;;  %v498_v2 = vld [vmem:[%s1815_s17 + $0x58] sm:$0xff]  ;;  %v507_v3 = vunpack.c.l.bf16 %v489_v59  ;;  %v491_v7 = vld [vmem:[%s1815_s17 + $0x20] sm:$0xff]  ;;  %v492_v13 = vld [vmem:[%s1815_s17 + $0x28] sm:$0xff] }
  0x3d   : > { %v523_v4 = vunpack.c.l.bf16 %v497_v60  ;;  %v510_v5 = vunpack.c.h.bf16 %v490_v1  ;;  %v526_v6 = vunpack.c.h.bf16 %v498_v2  ;;  %v499_v8 = vld [vmem:[%s1815_s17 + $0x60] sm:$0xff]  ;;  %v509_v9 = vunpack.c.l.bf16 %v490_v1  ;;  %v500_v14 = vld [vmem:[%s1815_s17 + $0x68] sm:$0xff]  ;;  %v493_v19 = vld [vmem:[%s1815_s17 + $0x30] sm:$0xff] }
  0x3e   : > { %v525_v10 = vunpack.c.l.bf16 %v498_v2  ;;  %v512_v11 = vunpack.c.h.bf16 %v491_v7  ;;  %v528_v12 = vunpack.c.h.bf16 %v499_v8  ;;  %v511_v15 = vunpack.c.l.bf16 %v491_v7  ;;  %v501_v20 = vld [vmem:[%s1815_s17 + $0x70] sm:$0xff]  ;;  %v494_v25 = vld [vmem:[%s1815_s17 + $0x38] sm:$0xff]  ;;  %v535_v35 = vld [vmem:[#allocation2] sm:$0xff] }
  0x3f   : > { %1575 = vmatpush3.bf16.msra.mxu0 %v1574_v29  ;;  %1603 = vmatpush3.bf16.msra.mxu1 %v1574_v29  ;;  %v527_v16 = vunpack.c.l.bf16 %v499_v8  ;;  %v514_v17 = vunpack.c.h.bf16 %v492_v13  ;;  %v530_v18 = vunpack.c.h.bf16 %v500_v14  ;;  %v513_v21 = vunpack.c.l.bf16 %v492_v13  ;;  %v502_v26 = vld [vmem:[%s1815_s17 + $0x78] sm:$0xff]  ;;  %v536_v45 = vld [vmem:[#allocation2 + $0x8] sm:$0xff]  ;;  %v547_v13 = vld [vmem:[#allocation2 + $0x60] sm:$0xff] }
  0x40   : > { %1577 = vmatprep.subr.bf16.mxu0 %v1576_v31  ;;  %1596 = vmatprep.subr.bf16.mxu1 %v1576_v31  ;;  %v529_v22 = vunpack.c.l.bf16 %v500_v14  ;;  %v516_v23 = vunpack.c.h.bf16 %v493_v19  ;;  %v532_v24 = vunpack.c.h.bf16 %v501_v20  ;;  %v515_v27 = vunpack.c.l.bf16 %v493_v19  ;;  %v544_v47 = vld [vmem:[#allocation2 + $0x48] sm:$0xff]  ;;  %v538_v1 = vld [vmem:[#allocation2 + $0x18] sm:$0xff] }
  0x41   : > { %v531_v28 = vunpack.c.l.bf16 %v501_v20  ;;  %v518_v29 = vunpack.c.h.bf16 %v494_v25  ;;  %v534_v30 = vunpack.c.h.bf16 %v502_v26  ;;  %v517_v31 = vunpack.c.l.bf16 %v494_v25 }
  0x42   : > { %v533_v32 = vunpack.c.l.bf16 %v502_v26 }
  0x43   : > { %1579 = vmatpush3.bf16.msra.mxu0 %v1578_v36  ;;  %1604 = vmatpush3.bf16.msra.mxu1 %v1578_v36 }
  0x44   : > { %1581 = vmatprep.subr.bf16.mxu0 %v1580_v37  ;;  %1597 = vmatprep.subr.bf16.mxu1 %v1580_v37  ;;  %v543_v37 = vld [vmem:[#allocation2 + $0x40] sm:$0xff] }
  0x47   : > { %1583 = vmatpush3.bf16.msra.mxu0 %v1582_v42  ;;  %1605 = vmatpush3.bf16.msra.mxu1 %v1582_v42 }
  0x48   : > { %1585 = vmatprep.subr.bf16.mxu0 %v1584_v43  ;;  %1598 = vmatprep.subr.bf16.mxu1 %v1584_v43 }
  0x4b   : > { %1587 = vmatpush3.bf16.msra.mxu0 %v1586_v48  ;;  %1606 = vmatpush3.bf16.msra.mxu1 %v1586_v48 }
  0x4c   : > { %1589 = vmatprep.subr.bf16.mxu0 %v1588_v49  ;;  %1599 = vmatprep.subr.bf16.mxu1 %v1588_v49 }
  0x4f   : > { %1591 = vmatpush3.bf16.msra.mxu0 %v1590_v52  ;;  %1607 = vmatpush3.bf16.msra.mxu1 %v1590_v52 }
  0x52   : > { %648 = vmatmul.mubr.f32.vlgmr.msra.gmra.mrb[0].mxu0 %v503_v55  ;;  %688 = vmatmul.mubr.f32.vlgmr.msra.gmra.mrb[0].mxu1 %v519_v56  ;;  %v537_v55 = vld [vmem:[#allocation2 + $0x10] sm:$0xff] }
  0x53   : > { %652 = vmatprep.mubr.f32.mxu0 %v506_v57  ;;  %692 = vmatprep.mubr.f32.mxu1 %v522_v58  ;;  %v545_v57 = vld [vmem:[#allocation2 + $0x50] sm:$0xff] }
  0x56   : > { %653 = vmatmul.mubr.f32.gmra.mrb[2].mxu0 %v505_v61  ;;  %693 = vmatmul.mubr.f32.gmra.mrb[2].mxu1 %v521_v62 }
  0x57   : > { %657 = vmatprep.mubr.f32.mxu0 %v508_v63  ;;  %697 = vmatprep.mubr.f32.mxu1 %v524_v0 }
  0x5a   : > { %658 = vmatmul.mubr.f32.gmra.mrb[4].mxu0 %v507_v3  ;;  %698 = vmatmul.mubr.f32.gmra.mrb[4].mxu1 %v523_v4  ;;  %v546_v3 = vld [vmem:[#allocation2 + $0x58] sm:$0xff] }
  0x5b   : > { %662 = vmatprep.mubr.f32.mxu0 %v510_v5  ;;  %702 = vmatprep.mubr.f32.mxu1 %v526_v6 }
  0x5e   : > { %663 = vmatmul.mubr.f32.gmra.mrb[6].mxu0 %v509_v9  ;;  %703 = vmatmul.mubr.f32.gmra.mrb[6].mxu1 %v525_v10 }
  0x5f   : > { %667 = vmatprep.mubr.f32.mxu0 %v512_v11  ;;  %707 = vmatprep.mubr.f32.mxu1 %v528_v12  ;;  %v539_v11 = vld [vmem:[#allocation2 + $0x20] sm:$0xff] }
  0x62   : > { %668 = vmatmul.mubr.f32.gmra.mrb[8].mxu0 %v511_v15  ;;  %708 = vmatmul.mubr.f32.gmra.mrb[8].mxu1 %v527_v16 }
  0x63   : > { %672 = vmatprep.mubr.f32.mxu0 %v514_v17  ;;  %712 = vmatprep.mubr.f32.mxu1 %v530_v18 }
  0x66   : > { %673 = vmatmul.mubr.f32.gmra.mrb[10].mxu0 %v513_v21  ;;  %713 = vmatmul.mubr.f32.gmra.mrb[10].mxu1 %v529_v22  ;;  %v540_v21 = vld [vmem:[#allocation2 + $0x28] sm:$0xff] }
  0x67   : > { %677 = vmatprep.mubr.f32.mxu0 %v516_v23  ;;  %717 = vmatprep.mubr.f32.mxu1 %v532_v24  ;;  %v548_v23 = vld [vmem:[#allocation2 + $0x68] sm:$0xff] }
  0x6a   : > { %678 = vmatmul.mubr.f32.gmra.mrb[12].mxu0 %v515_v27  ;;  %718 = vmatmul.mubr.f32.gmra.mrb[12].mxu1 %v531_v28 }
  0x6b   : > { %682 = vmatprep.mubr.f32.mxu0 %v518_v29  ;;  %722 = vmatprep.mubr.f32.mxu1 %v534_v30 }
  0x6e   : > { %683 = vmatmul.mubr.f32.gmra.mrb[14].mxu0 %v517_v31  ;;  %723 = vmatmul.mubr.f32.gmra.mrb[14].mxu1 %v533_v32  ;;  %v541_v31 = vld [vmem:[#allocation2 + $0x30] sm:$0xff] }
 0x125   : > { %v1426_v33 = vpop.f32.mrb[0].mxu0  ;;  %v1450_v34 = vpop.f32.mrb[0].mxu1 }
 0x126   : > { %v1427_v36 = vpop.f32.mrb[1].mxu0  ;;  %v1451_v38 = vpop.f32.mrb[1].mxu1 }
 0x127   : > { %v1428_v39 = vadd.f32 %v1427_v36, %v1426_v33  ;;  %v1452_v40 = vadd.f32 %v1451_v38, %v1450_v34  ;;  %v549_v33 = vld [vmem:[#allocation2 + $0x70] sm:$0xff] }
 0x129   : > { %v728_v41 = vadd.f32 %v1428_v39, %v535_v35  ;;  %v736_v42 = vadd.f32 %v1452_v40, %v543_v37  ;;  %v1429_v43 = vpop.f32.mrb[2].mxu0  ;;  %v1453_v44 = vpop.f32.mrb[2].mxu1 }
 0x12a   : > { %v1430_v46 = vpop.f32.mrb[3].mxu0  ;;  %v1454_v48 = vpop.f32.mrb[3].mxu1 }
 0x12b   : > { %745 = vst.msk [vmem:[#allocation2] sm:$0xff] %vm458_vm0, %v728_v41  ;;  %753 = vst.msk [vmem:[#allocation2 + $0x40] sm:$0xff] %vm458_vm0, %v736_v42  ;;  %v1431_v49 = vadd.f32 %v1430_v46, %v1429_v43  ;;  %v1455_v50 = vadd.f32 %v1454_v48, %v1453_v44  ;;  %v542_v41 = vld [vmem:[#allocation2 + $0x38] sm:$0xff] }
 0x12c   : > { %v550_v43 = vld [vmem:[#allocation2 + $0x78] sm:$0xff] }
 0x12d   : > { %v729_v51 = vadd.f32 %v1431_v49, %v536_v45  ;;  %v737_v52 = vadd.f32 %v1455_v50, %v544_v47  ;;  %v1432_v53 = vpop.f32.mrb[4].mxu0  ;;  %v1456_v54 = vpop.f32.mrb[4].mxu1 }
 0x12e   : > { %v1433_v56 = vpop.f32.mrb[5].mxu0  ;;  %v1457_v58 = vpop.f32.mrb[5].mxu1 }
 0x12f   : > { %746 = vst.msk [vmem:[#allocation2 + $0x8] sm:$0xff] %vm458_vm0, %v729_v51  ;;  %754 = vst.msk [vmem:[#allocation2 + $0x48] sm:$0xff] %vm458_vm0, %v737_v52  ;;  %v1434_v59 = vadd.f32 %v1433_v56, %v1432_v53  ;;  %v1458_v60 = vadd.f32 %v1457_v58, %v1456_v54 }
 0x131   : > { %v730_v61 = vadd.f32 %v1434_v59, %v537_v55  ;;  %v738_v62 = vadd.f32 %v1458_v60, %v545_v57  ;;  %v1435_v63 = vpop.f32.mrb[6].mxu0  ;;  %v1459_v0 = vpop.f32.mrb[6].mxu1 }
 0x132   : > { %v1436_v2 = vpop.f32.mrb[7].mxu0  ;;  %v1460_v4 = vpop.f32.mrb[7].mxu1 }
 0x133   : > { %747 = vst.msk [vmem:[#allocation2 + $0x10] sm:$0xff] %vm458_vm0, %v730_v61  ;;  %755 = vst.msk [vmem:[#allocation2 + $0x50] sm:$0xff] %vm458_vm0, %v738_v62  ;;  %v1437_v5 = vadd.f32 %v1436_v2, %v1435_v63  ;;  %v1461_v6 = vadd.f32 %v1460_v4, %v1459_v0 }
 0x135   : > { %v731_v7 = vadd.f32 %v1437_v5, %v538_v1  ;;  %v739_v8 = vadd.f32 %v1461_v6, %v546_v3  ;;  %v1438_v9 = vpop.f32.mrb[8].mxu0  ;;  %v1462_v10 = vpop.f32.mrb[8].mxu1 }
 0x136   : > { %v1439_v12 = vpop.f32.mrb[9].mxu0  ;;  %v1463_v14 = vpop.f32.mrb[9].mxu1 }
 0x137   : > { %748 = vst.msk [vmem:[#allocation2 + $0x18] sm:$0xff] %vm458_vm0, %v731_v7  ;;  %756 = vst.msk [vmem:[#allocation2 + $0x58] sm:$0xff] %vm458_vm0, %v739_v8  ;;  %v1440_v15 = vadd.f32 %v1439_v12, %v1438_v9  ;;  %v1464_v16 = vadd.f32 %v1463_v14, %v1462_v10 }
 0x139   : > { %v732_v17 = vadd.f32 %v1440_v15, %v539_v11  ;;  %v740_v18 = vadd.f32 %v1464_v16, %v547_v13  ;;  %v1441_v19 = vpop.f32.mrb[10].mxu0  ;;  %v1465_v20 = vpop.f32.mrb[10].mxu1 }
 0x13a   : > { %v1442_v22 = vpop.f32.mrb[11].mxu0  ;;  %v1466_v24 = vpop.f32.mrb[11].mxu1 }
 0x13b   : > { %749 = vst.msk [vmem:[#allocation2 + $0x20] sm:$0xff] %vm458_vm0, %v732_v17  ;;  %757 = vst.msk [vmem:[#allocation2 + $0x60] sm:$0xff] %vm458_vm0, %v740_v18  ;;  %v1443_v25 = vadd.f32 %v1442_v22, %v1441_v19  ;;  %v1467_v26 = vadd.f32 %v1466_v24, %v1465_v20 }
 0x13d   : > { %v733_v27 = vadd.f32 %v1443_v25, %v540_v21  ;;  %v741_v28 = vadd.f32 %v1467_v26, %v548_v23  ;;  %v1444_v29 = vpop.f32.mrb[12].mxu0  ;;  %v1468_v30 = vpop.f32.mrb[12].mxu1 }
 0x13e   : > { %v1445_v32 = vpop.f32.mrb[13].mxu0  ;;  %v1469_v34 = vpop.f32.mrb[13].mxu1 }
 0x13f   : > { %750 = vst.msk [vmem:[#allocation2 + $0x28] sm:$0xff] %vm458_vm0, %v733_v27  ;;  %758 = vst.msk [vmem:[#allocation2 + $0x68] sm:$0xff] %vm458_vm0, %v741_v28  ;;  %v1446_v35 = vadd.f32 %v1445_v32, %v1444_v29  ;;  %v1470_v36 = vadd.f32 %v1469_v34, %v1468_v30 }
 0x141   : > { %v734_v37 = vadd.f32 %v1446_v35, %v541_v31  ;;  %v742_v38 = vadd.f32 %v1470_v36, %v549_v33  ;;  %v1447_v39 = vpop.f32.mrb[14].mxu0  ;;  %v1471_v40 = vpop.f32.mrb[14].mxu1 }
 0x142   : > { %v1448_v42 = vpop.f32.mrb[15].mxu0  ;;  %v1472_v44 = vpop.f32.mrb[15].mxu1 }
 0x143   : > { %751 = vst.msk [vmem:[#allocation2 + $0x30] sm:$0xff] %vm458_vm0, %v734_v37  ;;  %759 = vst.msk [vmem:[#allocation2 + $0x70] sm:$0xff] %vm458_vm0, %v742_v38  ;;  %v1449_v45 = vadd.f32 %v1448_v42, %v1447_v39  ;;  %v1473_v46 = vadd.f32 %v1472_v44, %v1471_v40 }
 0x145   : > { %v735_v47 = vadd.f32 %v1449_v45, %v542_v41  ;;  %v743_v48 = vadd.f32 %v1473_v46, %v550_v43 }
 0x147   : > { %752 = vst.msk [vmem:[#allocation2 + $0x38] sm:$0xff] %vm458_vm0, %v735_v47  ;;  %760 = vst.msk [vmem:[#allocation2 + $0x78] sm:$0xff] %vm458_vm0, %v743_v48 }
 0x148 PF: > { %v797_v49 = vld [vmem:[%s2007_s6] sm:$0xff]  ;;  %v782_v53 = vld [vmem:[#allocation2 + $0x8] sm:$0xff]  ;;  %v783_v55 = vld [vmem:[#allocation2 + $0x10] sm:$0xff]  ;;  %vm1224_vm1 = vcmask 261120  }
 0x149   : > { %v780_v50 = vld [vmem:[%s2006_s5] sm:$0xff]  ;;  %1508 = vmatprep.subr.mxu1 %v797_v49  ;;  %v765_v54 = vld [vmem:[%s1804_s26 + $0x8] sm:$0xff]  ;;  %v766_v56 = vld [vmem:[%s1804_s26 + $0x10] sm:$0xff] }
 0x14a   : > { %v781_v51 = vld [vmem:[#allocation2] sm:$0xff]  ;;  %1534 = vmatprep.subr.mxu0 %v780_v50  ;;  %1509 = vmatpush3.msra.mxu1 %v797_v49  ;;  %v784_v57 = vld [vmem:[#allocation2 + $0x18] sm:$0xff]  ;;  %v786_v61 = vld [vmem:[#allocation2 + $0x28] sm:$0xff] }
 0x14b   : > { %v764_v52 = vld [vmem:[%s1804_s26] sm:$0xff]  ;;  %1510 = vmatprep.mubr.msk.f32.mxu1 %vm458_vm0, %v781_v51  ;;  %1535 = vmatpush3.msra.mxu0 %v780_v50  ;;  %v767_v58 = vld [vmem:[%s1804_s26 + $0x18] sm:$0xff]  ;;  %v769_v62 = vld [vmem:[%s1804_s26 + $0x28] sm:$0xff] }
 0x14c   : > { %1536 = vmatprep.mubr.msk.f32.mxu0 %vm458_vm0, %v764_v52  ;;  %1511 = vmatmul.mubr.msk.f32.vlgmr.msra.gmra.mrb[0].mxu1 %vm458_vm0, %v782_v53  ;;  %v785_v59 = vld [vmem:[#allocation2 + $0x20] sm:$0xff]  ;;  %v787_v63 = vld [vmem:[#allocation2 + $0x30] sm:$0xff]  ;;  %v771_v2 = vld [vmem:[%s1804_s26 + $0x38] sm:$0xff] }
 0x14d   : > { %1537 = vmatmul.mubr.msk.f32.vlgmr.msra.gmra.mrb[0].mxu0 %vm458_vm0, %v765_v54  ;;  %1513 = vmatprep.mubr.msk.f32.mxu1 %vm458_vm0, %v783_v55  ;;  %v768_v60 = vld [vmem:[%s1804_s26 + $0x20] sm:$0xff]  ;;  %v770_v0 = vld [vmem:[%s1804_s26 + $0x30] sm:$0xff]  ;;  %v790_v5 = vld [vmem:[#allocation2 + $0x48] sm:$0xff] }
 0x14e   : > { %1539 = vmatprep.mubr.msk.f32.mxu0 %vm458_vm0, %v766_v56  ;;  %v788_v1 = vld [vmem:[#allocation2 + $0x38] sm:$0xff]  ;;  %v789_v3 = vld [vmem:[#allocation2 + $0x40] sm:$0xff]  ;;  %v773_v6 = vld [vmem:[%s1804_s26 + $0x48] sm:$0xff] }
 0x14f   : > { %v772_v4 = vld [vmem:[%s1804_s26 + $0x40] sm:$0xff]  ;;  %v791_v7 = vld [vmem:[#allocation2 + $0x50] sm:$0xff]  ;;  %v792_v9 = vld [vmem:[#allocation2 + $0x58] sm:$0xff] }
 0x150   : > { %1514 = vmatmul.mubr.msk.f32.gmra.mrb[2].mxu1 %vm458_vm0, %v784_v57  ;;  %v774_v8 = vld [vmem:[%s1804_s26 + $0x50] sm:$0xff]  ;;  %v775_v10 = vld [vmem:[%s1804_s26 + $0x58] sm:$0xff]  ;;  %v793_v11 = vld [vmem:[#allocation2 + $0x60] sm:$0xff] }
 0x151   : > { %1540 = vmatmul.mubr.msk.f32.gmra.mrb[2].mxu0 %vm458_vm0, %v767_v58  ;;  %1516 = vmatprep.mubr.msk.f32.mxu1 %vm458_vm0, %v785_v59  ;;  %v776_v12 = vld [vmem:[%s1804_s26 + $0x60] sm:$0xff]  ;;  %v794_v13 = vld [vmem:[#allocation2 + $0x68] sm:$0xff]  ;;  %v795_v15 = vld [vmem:[#allocation2 + $0x70] sm:$0xff] }
 0x152   : > { %1542 = vmatprep.mubr.msk.f32.mxu0 %vm458_vm0, %v768_v60  ;;  %v777_v14 = vld [vmem:[%s1804_s26 + $0x68] sm:$0xff]  ;;  %v778_v16 = vld [vmem:[%s1804_s26 + $0x70] sm:$0xff]  ;;  %v796_v17 = vld [vmem:[#allocation2 + $0x78] sm:$0xff] }
 0x153   : > { %v779_v18 = vld [vmem:[%s1804_s26 + $0x78] sm:$0xff]  ;;  %v1943_v21 = vld [vmem:[%s2008_s7] ss:$0 sm:$0xff] }
 0x154   : > { %1517 = vmatmul.mubr.msk.f32.gmra.mrb[4].mxu1 %vm458_vm0, %v786_v61 }
 0x155   : > { %1543 = vmatmul.mubr.msk.f32.gmra.mrb[4].mxu0 %vm458_vm0, %v769_v62  ;;  %1519 = vmatprep.mubr.msk.f32.mxu1 %vm458_vm0, %v787_v63 }
 0x156   : > { %1545 = vmatprep.mubr.msk.f32.mxu0 %vm458_vm0, %v770_v0 }
 0x158   : > { %1520 = vmatmul.mubr.msk.f32.gmra.mrb[6].mxu1 %vm458_vm0, %v788_v1 }
 0x159   : > { %1546 = vmatmul.mubr.msk.f32.gmra.mrb[6].mxu0 %vm458_vm0, %v771_v2  ;;  %1522 = vmatprep.mubr.msk.f32.mxu1 %vm458_vm0, %v789_v3 }
 0x15a   : > { %1548 = vmatprep.mubr.msk.f32.mxu0 %vm458_vm0, %v772_v4 }
 0x15c   : > { %1523 = vmatmul.mubr.msk.f32.gmra.mrb[8].mxu1 %vm458_vm0, %v790_v5 }
 0x15d   : > { %1549 = vmatmul.mubr.msk.f32.gmra.mrb[8].mxu0 %vm458_vm0, %v773_v6  ;;  %1525 = vmatprep.mubr.msk.f32.mxu1 %vm458_vm0, %v791_v7 }
 0x15e   : > { %1551 = vmatprep.mubr.msk.f32.mxu0 %vm458_vm0, %v774_v8 }
 0x160   : > { %1526 = vmatmul.mubr.msk.f32.gmra.mrb[10].mxu1 %vm458_vm0, %v792_v9 }
 0x161   : > { %1552 = vmatmul.mubr.msk.f32.gmra.mrb[10].mxu0 %vm458_vm0, %v775_v10  ;;  %1528 = vmatprep.mubr.msk.f32.mxu1 %vm458_vm0, %v793_v11 }
 0x162   : > { %1554 = vmatprep.mubr.msk.f32.mxu0 %vm458_vm0, %v776_v12 }
 0x164   : > { %1529 = vmatmul.mubr.msk.f32.gmra.mrb[12].mxu1 %vm458_vm0, %v794_v13 }
 0x165   : > { %1555 = vmatmul.mubr.msk.f32.gmra.mrb[12].mxu0 %vm458_vm0, %v777_v14  ;;  %1531 = vmatprep.mubr.msk.f32.mxu1 %vm458_vm0, %v795_v15 }
 0x166   : > { %1557 = vmatprep.mubr.msk.f32.mxu0 %vm458_vm0, %v778_v16 }
 0x168   : > { %1532 = vmatmul.mubr.msk.f32.gmra.mrb[14].mxu1 %vm458_vm0, %v796_v17 }
 0x169   : > { %1558 = vmatmul.mubr.msk.f32.gmra.mrb[14].mxu0 %vm458_vm0, %v779_v18 }
 0x21f   : > { %v1512_v19 = vpop.f32.mrb[0].mxu1 }
 0x220   : > { %v1538_v20 = vpop.f32.mrb[0].mxu0  ;;  %v913_v23 = vpop.f32.mrb[1].mxu1 }
 0x221   : > { %v1112_v22 = vadd.f32 %v1538_v20, %v1512_v19  ;;  %v1106_v24 = vpop.f32.mrb[1].mxu0 }
 0x222   : > { %v1107_v25 = vadd.f32 %v1106_v24, %v913_v23 }
 0x223   : > { %v1193_v26 = vadd.f32 %v1943_v21, %v1112_v22  ;;  %v1515_v28 = vpop.f32.mrb[2].mxu1 }
 0x224   : > { %v1192_v27 = vadd.f32 %v1943_v21, %v1107_v25  ;;  %v1541_v29 = vpop.f32.mrb[2].mxu0  ;;  %v923_v32 = vpop.f32.mrb[3].mxu1 }
 0x225   : > { %v1209_v30 = vmax.f32 %v1193_v26, 0.0  ;;  %v1122_v31 = vadd.f32 %v1541_v29, %v1515_v28  ;;  %v1116_v33 = vpop.f32.mrb[3].mxu0 }
 0x226   : > { %v1208_v34 = vmax.f32 %v1192_v27, 0.0  ;;  %v1117_v35 = vadd.f32 %v1116_v33, %v923_v32 }
 0x227   : > { %1226 = vst.msk [vmem:[%s1809_s29 + $0x8] sm:$0xff] %vm1224_vm1, %v1209_v30  ;;  %v1195_v36 = vadd.f32 %v1943_v21, %v1122_v31  ;;  %v1518_v38 = vpop.f32.mrb[4].mxu1 }
 0x228   : > { %1225 = vst.msk [vmem:[%s1809_s29] sm:$0xff] %vm1224_vm1, %v1208_v34  ;;  %v1194_v37 = vadd.f32 %v1943_v21, %v1117_v35  ;;  %v1544_v39 = vpop.f32.mrb[4].mxu0  ;;  %v933_v42 = vpop.f32.mrb[5].mxu1 }
 0x229   : > { %v1211_v40 = vmax.f32 %v1195_v36, 0.0  ;;  %v1132_v41 = vadd.f32 %v1544_v39, %v1518_v38  ;;  %v1126_v43 = vpop.f32.mrb[5].mxu0 }
 0x22a   : > { %v1210_v44 = vmax.f32 %v1194_v37, 0.0  ;;  %v1127_v45 = vadd.f32 %v1126_v43, %v933_v42 }
 0x22b   : > { %1228 = vst.msk [vmem:[%s1809_s29 + $0x18] sm:$0xff] %vm1224_vm1, %v1211_v40  ;;  %v1197_v46 = vadd.f32 %v1943_v21, %v1132_v41  ;;  %v1521_v48 = vpop.f32.mrb[6].mxu1 }
 0x22c   : > { %1227 = vst.msk [vmem:[%s1809_s29 + $0x10] sm:$0xff] %vm1224_vm1, %v1210_v44  ;;  %v1196_v47 = vadd.f32 %v1943_v21, %v1127_v45  ;;  %v1547_v49 = vpop.f32.mrb[6].mxu0  ;;  %v943_v52 = vpop.f32.mrb[7].mxu1 }
 0x22d   : > { %v1213_v50 = vmax.f32 %v1197_v46, 0.0  ;;  %v1142_v51 = vadd.f32 %v1547_v49, %v1521_v48  ;;  %v1136_v53 = vpop.f32.mrb[7].mxu0 }
 0x22e   : > { %v1212_v54 = vmax.f32 %v1196_v47, 0.0  ;;  %v1137_v55 = vadd.f32 %v1136_v53, %v943_v52 }
 0x22f   : > { %1230 = vst.msk [vmem:[%s1809_s29 + $0x28] sm:$0xff] %vm1224_vm1, %v1213_v50  ;;  %v1199_v56 = vadd.f32 %v1943_v21, %v1142_v51  ;;  %v1524_v58 = vpop.f32.mrb[8].mxu1 }
 0x230   : > { %1229 = vst.msk [vmem:[%s1809_s29 + $0x20] sm:$0xff] %vm1224_vm1, %v1212_v54  ;;  %v1198_v57 = vadd.f32 %v1943_v21, %v1137_v55  ;;  %v1550_v59 = vpop.f32.mrb[8].mxu0  ;;  %v953_v62 = vpop.f32.mrb[9].mxu1 }
 0x231   : > { %v1215_v60 = vmax.f32 %v1199_v56, 0.0  ;;  %v1152_v61 = vadd.f32 %v1550_v59, %v1524_v58  ;;  %v1146_v63 = vpop.f32.mrb[9].mxu0 }
 0x232   : > { %v1214_v0 = vmax.f32 %v1198_v57, 0.0  ;;  %v1147_v1 = vadd.f32 %v1146_v63, %v953_v62 }
 0x233   : > { %1232 = vst.msk [vmem:[%s1809_s29 + $0x38] sm:$0xff] %vm1224_vm1, %v1215_v60  ;;  %v1201_v2 = vadd.f32 %v1943_v21, %v1152_v61  ;;  %v1527_v4 = vpop.f32.mrb[10].mxu1 }
 0x234   : > { %1231 = vst.msk [vmem:[%s1809_s29 + $0x30] sm:$0xff] %vm1224_vm1, %v1214_v0  ;;  %v1200_v3 = vadd.f32 %v1943_v21, %v1147_v1  ;;  %v1553_v5 = vpop.f32.mrb[10].mxu0  ;;  %v963_v8 = vpop.f32.mrb[11].mxu1 }
 0x235   : > { %v1217_v6 = vmax.f32 %v1201_v2, 0.0  ;;  %v1162_v7 = vadd.f32 %v1553_v5, %v1527_v4  ;;  %v1156_v9 = vpop.f32.mrb[11].mxu0 }
 0x236   : > { %v1216_v10 = vmax.f32 %v1200_v3, 0.0  ;;  %v1157_v11 = vadd.f32 %v1156_v9, %v963_v8 }
 0x237   : > { %1234 = vst.msk [vmem:[%s1809_s29 + $0x48] sm:$0xff] %vm1224_vm1, %v1217_v6  ;;  %v1203_v12 = vadd.f32 %v1943_v21, %v1162_v7  ;;  %v1530_v14 = vpop.f32.mrb[12].mxu1 }
 0x238   : > { %1233 = vst.msk [vmem:[%s1809_s29 + $0x40] sm:$0xff] %vm1224_vm1, %v1216_v10  ;;  %v1202_v13 = vadd.f32 %v1943_v21, %v1157_v11  ;;  %v1556_v15 = vpop.f32.mrb[12].mxu0  ;;  %v973_v18 = vpop.f32.mrb[13].mxu1 }
 0x239   : > { %v1219_v16 = vmax.f32 %v1203_v12, 0.0  ;;  %v1172_v17 = vadd.f32 %v1556_v15, %v1530_v14  ;;  %v1166_v19 = vpop.f32.mrb[13].mxu0 }
 0x23a   : > { %v1218_v20 = vmax.f32 %v1202_v13, 0.0  ;;  %v1167_v22 = vadd.f32 %v1166_v19, %v973_v18 }
 0x23b   : > { %1236 = vst.msk [vmem:[%s1809_s29 + $0x58] sm:$0xff] %vm1224_vm1, %v1219_v16  ;;  %v1205_v23 = vadd.f32 %v1943_v21, %v1172_v17  ;;  %v1533_v25 = vpop.f32.mrb[14].mxu1 }
 0x23c   : > { %1235 = vst.msk [vmem:[%s1809_s29 + $0x50] sm:$0xff] %vm1224_vm1, %v1218_v20  ;;  %v1204_v24 = vadd.f32 %v1943_v21, %v1167_v22  ;;  %v1559_v26 = vpop.f32.mrb[14].mxu0  ;;  %v983_v29 = vpop.f32.mrb[15].mxu1 }
 0x23d   : > { %v1221_v27 = vmax.f32 %v1205_v23, 0.0  ;;  %v1182_v28 = vadd.f32 %v1559_v26, %v1533_v25  ;;  %v1176_v30 = vpop.f32.mrb[15].mxu0 }
 0x23e   : > { %v1220_v31 = vmax.f32 %v1204_v24, 0.0  ;;  %v1177_v32 = vadd.f32 %v1176_v30, %v983_v29 }
 0x23f   : > { %1238 = vst.msk [vmem:[%s1809_s29 + $0x68] sm:$0xff] %vm1224_vm1, %v1221_v27  ;;  %v1207_v33 = vadd.f32 %v1943_v21, %v1182_v28 }
 0x240   : > { %1237 = vst.msk [vmem:[%s1809_s29 + $0x60] sm:$0xff] %vm1224_vm1, %v1220_v31  ;;  %v1206_v34 = vadd.f32 %v1943_v21, %v1177_v32 }
 0x241   : > { %v1223_v35 = vmax.f32 %v1207_v33, 0.0 }
 0x242   : > { %v1222_v36 = vmax.f32 %v1206_v34, 0.0 }
 0x243   : > { %1240 = vst.msk [vmem:[%s1809_s29 + $0x78] sm:$0xff] %vm1224_vm1, %v1223_v35 }
 0x244   : > { %1239 = vst.msk [vmem:[%s1809_s29 + $0x70] sm:$0xff] %vm1224_vm1, %v1222_v36 }
 0x245 PF: > { %s28_s15 = sadd.s32 1, %s1699_s15   ;;  %s2012_s1 = smov %s1695_s14 }
 0x246   : > { %p25_p4 = scmp.ge.s32.totalorder %s28_s15, 4   ;;  %s2013_s14 = smov %s2015_s16 }
 0x248   :  { %27 = sbr.rel (!%p25_p4) target bundleno = 27 (0x1b), region = 92 }

// kernel: graph_of_graphs_forward.3
= control target key start
LH: loop header
LB: loop body
LE: loop exit
PB: predicated region body
PF: predicated region fallthrough
CT: control target
= control target key end

     0   :  { %s2257_s0 = inlined_call_operand.vmem [shape: s32[2,1], index: 0, kind: input, shape index: {}]   ;;  %s2258_s2 = inlined_call_operand.vmem [shape: bf16[256,256], index: 2, kind: input, shape index: {}]   ;;  %s2259_s3 = inlined_call_operand.vmem [shape: f32[256,32], index: 3, kind: input, shape index: {}, may-alias: {3,4}]   ;;  %s2260_s4 = inlined_call_operand.vmem [shape: f32[256,32], index: 4, kind: input, shape index: {}, may-alias: {3,4}]   ;;  %s2261_s5 = inlined_call_operand.vmem [shape: f32[32,32], index: 5, kind: input, shape index: {}]   ;;  %s2262_s6 = inlined_call_operand.vmem [shape: f32[32,32], index: 6, kind: input, shape index: {}]   ;;  %s2263_s7 = inlined_call_operand.vmem [shape: f32[1,32], index: 7, kind: input, shape index: {}]   ;;  %s2264_s8 = inlined_call_operand.vmem [shape: f32[4,256], index: 8, kind: input, shape index: {}]   ;;  %s2265_s9 = inlined_call_operand.vmem [shape: f32[2,4,32], index: 9, kind: output, shape index: {}]   ;;  %s2266_s1 = inlined_call_operand.vmem [shape: s32[2,1], index: 1, kind: input, shape index: {}]  }
   0x1   :  { %s14_s11 = sshll.u32 %s2257_s0, 4  ;;  %s18_s14 = sshll.u32 %s2266_s1, 4  ;;  %s15_s11 = int_to_ptr.vmem [resolvable:$true] %s14_s11  ;;  %s19_s14 = int_to_ptr.vmem [resolvable:$true] %s18_s14 }
   0x2   :  { %s1874_s15 = scalar_lea.vmem %s15_s11, 32  ;;  %p1879_p1 = scmp.lt.s32.totalorder %s15_s11, %s15_s11 }
   0x3   :  { %p1875_p0 = scmp.ne.s32.totalorder %s15_s11, %s1874_s15  ;;  %p1880_p2 = scmp.lt.s32.totalorder %s1874_s15, %s1874_s15 }
   0x5   :  { %p1881_p3 = por %p1880_p2, %p1879_p1 }
   0x7   :  { %p1882_p4 = pnand %p1881_p3, %p1875_p0 }
   0x9   :  { %1885 = shalt.err (!%p1882_p4)  }
   0xa   :  { %s1924_s16 = smov [#allocation4]   ;;  %s1886_s17 = scalar_lea.vmem %s19_s14, 32 }
   0xb   :  { %17 = dma.vmem_to_smem %s15_s11, 32, %s1924_s16, [#allocation3] }
   0xc   :  { %p1887_p5 = scmp.ne.s32.totalorder %s19_s14, %s1886_s17  ;;  %p1891_p6 = scmp.lt.s32.totalorder %s19_s14, %s19_s14 }
   0xd   :  { %p1892_p7 = scmp.lt.s32.totalorder %s1886_s17, %s1886_s17 }
   0xf   :  { %p1893_p8 = por %p1892_p7, %p1891_p6 }
  0x11   :  { %p1894_p9 = pnand %p1893_p8, %p1887_p5 }
  0x13   :  { %1897 = shalt.err (!%p1894_p9)  }
  0x14   :  { %s1925_s0 = smov [#allocation5]  }
  0x15   :  { %21 = dma.vmem_to_smem %s19_s14, 32, %s1925_s0, [#allocation3] }
  0x16   :  { %1910 = dma.done.wait [#allocation3], 64 }
  0x17   :  { %1911 = vsyncadd [#allocation3], 4294967232 }
  0x18   :  { %23 = sfence }
  0x19   :  { %s1985_s1 = smov 0   ;;  %s1987_s18 = smov 0  }
  0x1a   :  { %s1989_s19 = smov 0  }
  0x1b LB: > { %s41_s20 = sadd.s32 1, %s1918_s18  ;;  %p1455_p10 = scmp.ge.s32.totalorder %s1922_s19, 1  ;;  %s1922_s19 = sphi %s1989_s19, %s29_s19   ;;  %s1918_s18 = sphi %s1987_s18, %s2269_s18   ;;  %s1914_s1 = sphi %s1985_s1, %s2268_s1  }
  0x1c   : > { %p43_p11 = scmp.ge.s32.totalorder %s41_s20, 2  ;;  %p365_p12 = scmp.lt.s32.totalorder %s1922_s19, 3 }
  0x1e   : > { %s2271_s20 = smov (%p43_p11, %s41_s20), 0  ;;  %p366_p13 = pnand %p1455_p10, %p365_p12 }
  0x1f   : > { %s2006_s21 = sshll.u32 (!%p366_p13), %s1914_s1, 7  ;;  %s1457_s22 = sshll.u32 (!%p366_p13), %s1914_s1, 4  ;;  %vm499_vm0 = vcmask (!%p366_p13), 261120   ;;  %v1926_v0 = vmov (!%p366_p13), 0.0  }
  0x20   : > { %369 = sbr.rel (%p366_p13) target bundleno = 807 (0x327), region = 48  ;;  %s2010_s23 = sld [smem:[#allocation4 + %s2006_s21]] (!%p366_p13)  ;;  %500 = vst.msk [vmem:[#allocation2] sm:$0xff] (!%p366_p13), %vm499_vm0, %v1926_v0  ;;  %501 = vst.msk [vmem:[#allocation2 + $0x8] sm:$0xff] (!%p366_p13), %vm499_vm0, %v1926_v0 }
  0x21   : > { %p2012_p0 = scmp.lt.s32.totalorder (!%p366_p13), %s1457_s22, 31  ;;  %502 = vst.msk [vmem:[#allocation2 + $0x10] sm:$0xff] (!%p366_p13), %vm499_vm0, %v1926_v0  ;;  %503 = vst.msk [vmem:[#allocation2 + $0x18] sm:$0xff] (!%p366_p13), %vm499_vm0, %v1926_v0  ;;  %s466_s25 = sld [smem:[#allocation4 + %s2006_s21]] (!%p366_p13) }
  0x22   : > { %504 = vst.msk [vmem:[#allocation2 + $0x20] sm:$0xff] (!%p366_p13), %vm499_vm0, %v1926_v0  ;;  %505 = vst.msk [vmem:[#allocation2 + $0x28] sm:$0xff] (!%p366_p13), %vm499_vm0, %v1926_v0  ;;  %p487_p1 = scmp.lt.s32.totalorder (!%p366_p13), %s1914_s1, 1  ;;  %s523_s24 = sld [smem:[#allocation5 + %s2006_s21]] (!%p366_p13) }
  0x23   : > { %506 = vst.msk [vmem:[#allocation2 + $0x30] sm:$0xff] (!%p366_p13), %vm499_vm0, %v1926_v0  ;;  %507 = vst.msk [vmem:[#allocation2 + $0x38] sm:$0xff] (!%p366_p13), %vm499_vm0, %v1926_v0 }
  0x24   : > { %508 = vst.msk [vmem:[#allocation2 + $0x40] sm:$0xff] (!%p366_p13), %vm499_vm0, %v1926_v0  ;;  %509 = vst.msk [vmem:[#allocation2 + $0x48] sm:$0xff] (!%p366_p13), %vm499_vm0, %v1926_v0 }
  0x25   : > { %510 = vst.msk [vmem:[#allocation2 + $0x50] sm:$0xff] (!%p366_p13), %vm499_vm0, %v1926_v0  ;;  %511 = vst.msk [vmem:[#allocation2 + $0x58] sm:$0xff] (!%p366_p13), %vm499_vm0, %v1926_v0 }
  0x26   : > { %512 = vst.msk [vmem:[#allocation2 + $0x60] sm:$0xff] (!%p366_p13), %vm499_vm0, %v1926_v0  ;;  %513 = vst.msk [vmem:[#allocation2 + $0x68] sm:$0xff] (!%p366_p13), %vm499_vm0, %v1926_v0  ;;  %s1458_s11 = sshll.u32 (!%p366_p13), %s2010_s23, 1 }
  0x27   : > { %514 = vst.msk [vmem:[#allocation2 + $0x70] sm:$0xff] %vm499_vm0, %v1926_v0  ;;  %515 = vst.msk [vmem:[#allocation2 + $0x78] sm:$0xff] %vm499_vm0, %v1926_v0  ;;  %s2273_s22 = smov (!%p2012_p0, %s1457_s22), 31  ;;  %s2275_s1 = smov (!%p487_p1, %s1914_s1), 1 }
  0x28   : > { %s1459_s26 = sshll.u32 %s2273_s22, 1  ;;  %s1465_s27 = sshll.u32 %s2273_s22, 3 }
  0x29   : > { %s2056_s30 = scalar_lea.vmem %s2260_s4, %s1465_s27  ;;  %s1466_s10 = sshll.u32 %s2275_s1, 2 }
  0x2a   : > { %s2062_s14 = scalar_lea.vmem %s2264_s8, %s1466_s10  ;;  %p443_p2 = scmp.lt.s32.totalorder %s1458_s11, 1 }
  0x2b   : > { %s1462_s15 = sshll.u32 %s466_s25, 5  ;;  %s2067_s0 = scalar_lea.vmem %s2265_s9, %s1466_s10 }
  0x2c   : > { %p468_p3 = scmp.lt.s32.totalorder %s1462_s15, 31  ;;  %s2277_s11 = smov (!%p443_p2, %s1458_s11), 1 }
  0x2d   : > { %s446_s22 = sadd.s32 %s1459_s26, %s2277_s11  ;;  %p1469_p4 = scmp.eq.s32.totalorder %s523_s24, 0 }
  0x2e   : > { %s2279_s15 = smov (!%p468_p3, %s1462_s15), 31  ;;  %s1460_s27 = sshll.u32 %s446_s22, 2 }
  0x2f   : > { %s1463_s1 = sshll.u32 %s2279_s15, 3  ;;  %s2073_s29 = scalar_lea.vmem %s2258_s2, %s1460_s27 }
  0x30   : > { %s2078_s25 = scalar_lea.vmem %s2259_s3, %s1463_s1  ;;  %527 = sbr.rel (%p1469_p4) target bundleno = 330 (0x14a), region = 56  ;;  %v528_v26 = vld [vmem:[%s2073_s29] sm:$0xff] (!%p1469_p4)  ;;  %v529_v53 = vld [vmem:[%s2073_s29 + $0x8] sm:$0xff] (!%p1469_p4)  ;;  %v530_v59 = vld [vmem:[%s2073_s29 + $0x10] sm:$0xff] (!%p1469_p4) }
  0x31   : > { %v608_v1 = vld [vmem:[%s2078_s25 + $0x80] sm:$0xff] (!%p1469_p4)  ;;  %v609_v2 = vld [vmem:[%s2078_s25 + $0x88] sm:$0xff] (!%p1469_p4)  ;;  %v610_v6 = vld [vmem:[%s2078_s25 + $0x90] sm:$0xff] (!%p1469_p4)  ;;  %v545_v27 = vunpack.c.h.bf16 (!%p1469_p4), %v528_v26  ;;  %v544_v55 = vunpack.c.l.bf16 (!%p1469_p4), %v528_v26  ;;  %v547_v57 = vunpack.c.h.bf16 (!%p1469_p4), %v529_v53  ;;  %v546_v61 = vunpack.c.l.bf16 (!%p1469_p4), %v529_v53 }
  0x32   : > { %v592_v3 = vld [vmem:[%s2078_s25] sm:$0xff] (!%p1469_p4)  ;;  %v1741_v4 = vpack.c.bf16 (!%p1469_p4), %v609_v2, %v608_v1  ;;  %v593_v5 = vld [vmem:[%s2078_s25 + $0x8] sm:$0xff] (!%p1469_p4)  ;;  %v611_v7 = vld [vmem:[%s2078_s25 + $0x98] sm:$0xff] (!%p1469_p4)  ;;  %v549_v63 = vunpack.c.h.bf16 (!%p1469_p4), %v530_v59 }
  0x33   : > { %v1743_v8 = vpack.c.bf16 (!%p1469_p4), %v593_v5, %v592_v3  ;;  %v1745_v9 = vpack.c.bf16 (!%p1469_p4), %v611_v7, %v610_v6  ;;  %v594_v10 = vld [vmem:[%s2078_s25 + $0x10] sm:$0xff] (!%p1469_p4)  ;;  %v595_v11 = vld [vmem:[%s2078_s25 + $0x18] sm:$0xff] (!%p1469_p4)  ;;  %v612_v12 = vld [vmem:[%s2078_s25 + $0xa0] sm:$0xff] (!%p1469_p4)  ;;  %688 = vmatprep.mubr.f32.mxu0 (!%p1469_p4), %v545_v27 }
  0x34   : > { %1742 = vmatprep.subr.bf16.mxu0 (!%p1469_p4), %v1741_v4  ;;  %1813 = vmatprep.subr.bf16.mxu1 (!%p1469_p4), %v1741_v4  ;;  %v613_v13 = vld [vmem:[%s2078_s25 + $0xa8] sm:$0xff] (!%p1469_p4)  ;;  %v1747_v14 = vpack.c.bf16 (!%p1469_p4), %v595_v11, %v594_v10  ;;  %v596_v16 = vld [vmem:[%s2078_s25 + $0x20] sm:$0xff] (!%p1469_p4)  ;;  %v614_v18 = vld [vmem:[%s2078_s25 + $0xb0] sm:$0xff] (!%p1469_p4)  ;;  %v548_v4 = vunpack.c.l.bf16 (!%p1469_p4), %v530_v59 }
  0x35   : > { %1744 = vmatpush3.bf16.msra.mxu0 (!%p1469_p4), %v1743_v8  ;;  %1821 = vmatpush3.bf16.msra.mxu1 (!%p1469_p4), %v1743_v8  ;;  %v1749_v15 = vpack.c.bf16 (!%p1469_p4), %v613_v13, %v612_v12  ;;  %v597_v17 = vld [vmem:[%s2078_s25 + $0x28] sm:$0xff] (!%p1469_p4)  ;;  %v615_v19 = vld [vmem:[%s2078_s25 + $0xb8] sm:$0xff] (!%p1469_p4)  ;;  %v598_v22 = vld [vmem:[%s2078_s25 + $0x30] sm:$0xff] (!%p1469_p4) }
  0x36   : > { %1746 = vmatprep.subr.bf16.mxu0 (!%p1469_p4), %v1745_v9  ;;  %1814 = vmatprep.subr.bf16.mxu1 (!%p1469_p4), %v1745_v9  ;;  %v1751_v20 = vpack.c.bf16 (!%p1469_p4), %v597_v17, %v596_v16  ;;  %v1753_v21 = vpack.c.bf16 (!%p1469_p4), %v615_v19, %v614_v18  ;;  %v599_v23 = vld [vmem:[%s2078_s25 + $0x38] sm:$0xff] (!%p1469_p4)  ;;  %v616_v24 = vld [vmem:[%s2078_s25 + $0xc0] sm:$0xff] (!%p1469_p4)  ;;  %v617_v25 = vld [vmem:[%s2078_s25 + $0xc8] sm:$0xff] (!%p1469_p4) }
  0x37   : > { %v536_v28 = vld [vmem:[%s2073_s29 + $0x40] sm:$0xff]  ;;  %v1755_v29 = vpack.c.bf16 %v599_v23, %v598_v22  ;;  %v1757_v31 = vpack.c.bf16 %v617_v25, %v616_v24  ;;  %v601_v33 = vld [vmem:[%s2078_s25 + $0x48] sm:$0xff]  ;;  %v618_v34 = vld [vmem:[%s2078_s25 + $0xd0] sm:$0xff] }
  0x38   : > { %v561_v30 = vunpack.c.h.bf16 %v536_v28  ;;  %v600_v32 = vld [vmem:[%s2078_s25 + $0x40] sm:$0xff]  ;;  %v619_v35 = vld [vmem:[%s2078_s25 + $0xd8] sm:$0xff]  ;;  %v602_v38 = vld [vmem:[%s2078_s25 + $0x50] sm:$0xff]  ;;  %v560_v56 = vunpack.c.l.bf16 %v536_v28 }
  0x39   : > { %1748 = vmatpush3.bf16.msra.mxu0 %v1747_v14  ;;  %1822 = vmatpush3.bf16.msra.mxu1 %v1747_v14  ;;  %v1759_v36 = vpack.c.bf16 %v601_v33, %v600_v32  ;;  %v1761_v37 = vpack.c.bf16 %v619_v35, %v618_v34  ;;  %v603_v39 = vld [vmem:[%s2078_s25 + $0x58] sm:$0xff]  ;;  %v620_v40 = vld [vmem:[%s2078_s25 + $0xe0] sm:$0xff]  ;;  %v621_v41 = vld [vmem:[%s2078_s25 + $0xe8] sm:$0xff] }
  0x3a   : > { %1750 = vmatprep.subr.bf16.mxu0 %v1749_v15  ;;  %1815 = vmatprep.subr.bf16.mxu1 %v1749_v15  ;;  %v1763_v42 = vpack.c.bf16 %v603_v39, %v602_v38  ;;  %v1765_v43 = vpack.c.bf16 %v621_v41, %v620_v40  ;;  %v604_v44 = vld [vmem:[%s2078_s25 + $0x60] sm:$0xff]  ;;  %v605_v45 = vld [vmem:[%s2078_s25 + $0x68] sm:$0xff]  ;;  %v622_v46 = vld [vmem:[%s2078_s25 + $0xf0] sm:$0xff] }
  0x3b   : > { %728 = vmatprep.mubr.f32.mxu1 %v561_v30  ;;  %v623_v47 = vld [vmem:[%s2078_s25 + $0xf8] sm:$0xff]  ;;  %v1767_v48 = vpack.c.bf16 %v605_v45, %v604_v44  ;;  %v606_v50 = vld [vmem:[%s2078_s25 + $0x70] sm:$0xff]  ;;  %v537_v54 = vld [vmem:[%s2073_s29 + $0x48] sm:$0xff] }
  0x3c   : > { %v1769_v49 = vpack.c.bf16 %v623_v47, %v622_v46  ;;  %v607_v51 = vld [vmem:[%s2078_s25 + $0x78] sm:$0xff]  ;;  %v563_v58 = vunpack.c.h.bf16 %v537_v54  ;;  %v538_v60 = vld [vmem:[%s2073_s29 + $0x50] sm:$0xff]  ;;  %v562_v62 = vunpack.c.l.bf16 %v537_v54  ;;  %v532_v8 = vld [vmem:[%s2073_s29 + $0x20] sm:$0xff] }
  0x3d   : > { %1752 = vmatpush3.bf16.msra.mxu0 %v1751_v20  ;;  %1823 = vmatpush3.bf16.msra.mxu1 %v1751_v20  ;;  %v1771_v52 = vpack.c.bf16 %v607_v51, %v606_v50  ;;  %v565_v1 = vunpack.c.h.bf16 %v538_v60  ;;  %v531_v2 = vld [vmem:[%s2073_s29 + $0x18] sm:$0xff]  ;;  %v564_v5 = vunpack.c.l.bf16 %v538_v60  ;;  %v540_v9 = vld [vmem:[%s2073_s29 + $0x60] sm:$0xff]  ;;  %v553_v12 = vunpack.c.h.bf16 %v532_v8  ;;  %v533_v14 = vld [vmem:[%s2073_s29 + $0x28] sm:$0xff] }
  0x3e   : > { %1754 = vmatprep.subr.bf16.mxu0 %v1753_v21  ;;  %1816 = vmatprep.subr.bf16.mxu1 %v1753_v21  ;;  %v539_v3 = vld [vmem:[%s2073_s29 + $0x58] sm:$0xff]  ;;  %v551_v6 = vunpack.c.h.bf16 %v531_v2  ;;  %v550_v10 = vunpack.c.l.bf16 %v531_v2  ;;  %v569_v13 = vunpack.c.h.bf16 %v540_v9  ;;  %v541_v15 = vld [vmem:[%s2073_s29 + $0x68] sm:$0xff]  ;;  %v552_v16 = vunpack.c.l.bf16 %v532_v8  ;;  %v534_v20 = vld [vmem:[%s2073_s29 + $0x30] sm:$0xff] }
  0x3f   : > { %v567_v7 = vunpack.c.h.bf16 %v539_v3  ;;  %v566_v11 = vunpack.c.l.bf16 %v539_v3  ;;  %v568_v17 = vunpack.c.l.bf16 %v540_v9  ;;  %v555_v18 = vunpack.c.h.bf16 %v533_v14  ;;  %v542_v21 = vld [vmem:[%s2073_s29 + $0x70] sm:$0xff]  ;;  %v535_v26 = vld [vmem:[%s2073_s29 + $0x38] sm:$0xff]  ;;  %v584_v38 = vld [vmem:[#allocation2 + $0x40] sm:$0xff] }
  0x40   : > { %v571_v19 = vunpack.c.h.bf16 %v541_v15  ;;  %v554_v22 = vunpack.c.l.bf16 %v533_v14  ;;  %v570_v23 = vunpack.c.l.bf16 %v541_v15  ;;  %v557_v24 = vunpack.c.h.bf16 %v534_v20  ;;  %v543_v27 = vld [vmem:[%s2073_s29 + $0x78] sm:$0xff]  ;;  %v577_v46 = vld [vmem:[#allocation2 + $0x8] sm:$0xff]  ;;  %v588_v15 = vld [vmem:[#allocation2 + $0x60] sm:$0xff] }
  0x41   : > { %1756 = vmatpush3.bf16.msra.mxu0 %v1755_v29  ;;  %1824 = vmatpush3.bf16.msra.mxu1 %v1755_v29  ;;  %v573_v25 = vunpack.c.h.bf16 %v542_v21  ;;  %v556_v28 = vunpack.c.l.bf16 %v534_v20  ;;  %v572_v29 = vunpack.c.l.bf16 %v542_v21  ;;  %v559_v30 = vunpack.c.h.bf16 %v535_v26  ;;  %v579_v3 = vld [vmem:[#allocation2 + $0x18] sm:$0xff] }
  0x42   : > { %1758 = vmatprep.subr.bf16.mxu0 %v1757_v31  ;;  %1817 = vmatprep.subr.bf16.mxu1 %v1757_v31  ;;  %v575_v31 = vunpack.c.h.bf16 %v543_v27  ;;  %v558_v32 = vunpack.c.l.bf16 %v535_v26  ;;  %v574_v33 = vunpack.c.l.bf16 %v543_v27 }
  0x45   : > { %1760 = vmatpush3.bf16.msra.mxu0 %v1759_v36  ;;  %1825 = vmatpush3.bf16.msra.mxu1 %v1759_v36  ;;  %v576_v36 = vld [vmem:[#allocation2] sm:$0xff] }
  0x46   : > { %1762 = vmatprep.subr.bf16.mxu0 %v1761_v37  ;;  %1818 = vmatprep.subr.bf16.mxu1 %v1761_v37 }
  0x49   : > { %1764 = vmatpush3.bf16.msra.mxu0 %v1763_v42  ;;  %1826 = vmatpush3.bf16.msra.mxu1 %v1763_v42 }
  0x4a   : > { %1766 = vmatprep.subr.bf16.mxu0 %v1765_v43  ;;  %1819 = vmatprep.subr.bf16.mxu1 %v1765_v43 }
  0x4d   : > { %1768 = vmatpush3.bf16.msra.mxu0 %v1767_v48  ;;  %1827 = vmatpush3.bf16.msra.mxu1 %v1767_v48  ;;  %v585_v48 = vld [vmem:[#allocation2 + $0x48] sm:$0xff] }
  0x4e   : > { %1770 = vmatprep.subr.bf16.mxu0 %v1769_v49  ;;  %1820 = vmatprep.subr.bf16.mxu1 %v1769_v49 }
  0x51   : > { %1772 = vmatpush3.bf16.msra.mxu0 %v1771_v52  ;;  %1828 = vmatpush3.bf16.msra.mxu1 %v1771_v52 }
  0x54   : > { %689 = vmatmul.mubr.f32.vlgmr.msra.gmra.mrb[0].mxu0 %v544_v55  ;;  %729 = vmatmul.mubr.f32.vlgmr.msra.gmra.mrb[0].mxu1 %v560_v56  ;;  %v578_v56 = vld [vmem:[#allocation2 + $0x10] sm:$0xff] }
  0x55   : > { %693 = vmatprep.mubr.f32.mxu0 %v547_v57  ;;  %733 = vmatprep.mubr.f32.mxu1 %v563_v58  ;;  %v586_v58 = vld [vmem:[#allocation2 + $0x50] sm:$0xff] }
  0x58   : > { %694 = vmatmul.mubr.f32.gmra.mrb[2].mxu0 %v546_v61  ;;  %734 = vmatmul.mubr.f32.gmra.mrb[2].mxu1 %v562_v62 }
  0x59   : > { %698 = vmatprep.mubr.f32.mxu0 %v549_v63  ;;  %738 = vmatprep.mubr.f32.mxu1 %v565_v1 }
  0x5c   : > { %699 = vmatmul.mubr.f32.gmra.mrb[4].mxu0 %v548_v4  ;;  %739 = vmatmul.mubr.f32.gmra.mrb[4].mxu1 %v564_v5  ;;  %v587_v5 = vld [vmem:[#allocation2 + $0x58] sm:$0xff] }
  0x5d   : > { %703 = vmatprep.mubr.f32.mxu0 %v551_v6  ;;  %743 = vmatprep.mubr.f32.mxu1 %v567_v7 }
  0x60   : > { %704 = vmatmul.mubr.f32.gmra.mrb[6].mxu0 %v550_v10  ;;  %744 = vmatmul.mubr.f32.gmra.mrb[6].mxu1 %v566_v11 }
  0x61   : > { %708 = vmatprep.mubr.f32.mxu0 %v553_v12  ;;  %748 = vmatprep.mubr.f32.mxu1 %v569_v13  ;;  %v580_v13 = vld [vmem:[#allocation2 + $0x20] sm:$0xff] }
  0x64   : > { %709 = vmatmul.mubr.f32.gmra.mrb[8].mxu0 %v552_v16  ;;  %749 = vmatmul.mubr.f32.gmra.mrb[8].mxu1 %v568_v17 }
  0x65   : > { %713 = vmatprep.mubr.f32.mxu0 %v555_v18  ;;  %753 = vmatprep.mubr.f32.mxu1 %v571_v19 }
  0x68   : > { %714 = vmatmul.mubr.f32.gmra.mrb[10].mxu0 %v554_v22  ;;  %754 = vmatmul.mubr.f32.gmra.mrb[10].mxu1 %v570_v23  ;;  %v581_v23 = vld [vmem:[#allocation2 + $0x28] sm:$0xff] }
  0x69   : > { %718 = vmatprep.mubr.f32.mxu0 %v557_v24  ;;  %758 = vmatprep.mubr.f32.mxu1 %v573_v25  ;;  %v589_v25 = vld [vmem:[#allocation2 + $0x68] sm:$0xff] }
  0x6c   : > { %719 = vmatmul.mubr.f32.gmra.mrb[12].mxu0 %v556_v28  ;;  %759 = vmatmul.mubr.f32.gmra.mrb[12].mxu1 %v572_v29 }
  0x6d   : > { %723 = vmatprep.mubr.f32.mxu0 %v559_v30  ;;  %763 = vmatprep.mubr.f32.mxu1 %v575_v31 }
  0x70   : > { %724 = vmatmul.mubr.f32.gmra.mrb[14].mxu0 %v558_v32  ;;  %764 = vmatmul.mubr.f32.gmra.mrb[14].mxu1 %v574_v33  ;;  %v582_v33 = vld [vmem:[#allocation2 + $0x30] sm:$0xff] }
 0x127   : > { %v1537_v34 = vpop.f32.mrb[0].mxu0  ;;  %v1561_v35 = vpop.f32.mrb[0].mxu1 }
 0x128   : > { %v1538_v37 = vpop.f32.mrb[1].mxu0  ;;  %v1562_v39 = vpop.f32.mrb[1].mxu1 }
 0x129   : > { %v1539_v40 = vadd.f32 %v1538_v37, %v1537_v34  ;;  %v1563_v41 = vadd.f32 %v1562_v39, %v1561_v35  ;;  %v590_v35 = vld [vmem:[#allocation2 + $0x70] sm:$0xff] }
 0x12b   : > { %v769_v42 = vadd.f32 %v1539_v40, %v576_v36  ;;  %v777_v43 = vadd.f32 %v1563_v41, %v584_v38  ;;  %v1540_v44 = vpop.f32.mrb[2].mxu0  ;;  %v1564_v45 = vpop.f32.mrb[2].mxu1 }
 0x12c   : > { %v1541_v47 = vpop.f32.mrb[3].mxu0  ;;  %v1565_v49 = vpop.f32.mrb[3].mxu1 }
 0x12d   : > { %786 = vst.msk [vmem:[#allocation2] sm:$0xff] %vm499_vm0, %v769_v42  ;;  %794 = vst.msk [vmem:[#allocation2 + $0x40] sm:$0xff] %vm499_vm0, %v777_v43  ;;  %v1542_v50 = vadd.f32 %v1541_v47, %v1540_v44  ;;  %v1566_v51 = vadd.f32 %v1565_v49, %v1564_v45  ;;  %v583_v43 = vld [vmem:[#allocation2 + $0x38] sm:$0xff] }
 0x12e   : > { %v591_v45 = vld [vmem:[#allocation2 + $0x78] sm:$0xff] }
 0x12f   : > { %v770_v52 = vadd.f32 %v1542_v50, %v577_v46  ;;  %v778_v53 = vadd.f32 %v1566_v51, %v585_v48  ;;  %v1543_v54 = vpop.f32.mrb[4].mxu0  ;;  %v1567_v55 = vpop.f32.mrb[4].mxu1 }
 0x130   : > { %v1544_v57 = vpop.f32.mrb[5].mxu0  ;;  %v1568_v59 = vpop.f32.mrb[5].mxu1 }
 0x131   : > { %787 = vst.msk [vmem:[#allocation2 + $0x8] sm:$0xff] %vm499_vm0, %v770_v52  ;;  %795 = vst.msk [vmem:[#allocation2 + $0x48] sm:$0xff] %vm499_vm0, %v778_v53  ;;  %v1545_v60 = vadd.f32 %v1544_v57, %v1543_v54  ;;  %v1569_v61 = vadd.f32 %v1568_v59, %v1567_v55 }
 0x133   : > { %v771_v62 = vadd.f32 %v1545_v60, %v578_v56  ;;  %v779_v63 = vadd.f32 %v1569_v61, %v586_v58  ;;  %v1546_v1 = vpop.f32.mrb[6].mxu0  ;;  %v1570_v2 = vpop.f32.mrb[6].mxu1 }
 0x134   : > { %v1547_v4 = vpop.f32.mrb[7].mxu0  ;;  %v1571_v6 = vpop.f32.mrb[7].mxu1 }
 0x135   : > { %788 = vst.msk [vmem:[#allocation2 + $0x10] sm:$0xff] %vm499_vm0, %v771_v62  ;;  %796 = vst.msk [vmem:[#allocation2 + $0x50] sm:$0xff] %vm499_vm0, %v779_v63  ;;  %v1548_v7 = vadd.f32 %v1547_v4, %v1546_v1  ;;  %v1572_v8 = vadd.f32 %v1571_v6, %v1570_v2 }
 0x137   : > { %v772_v9 = vadd.f32 %v1548_v7, %v579_v3  ;;  %v780_v10 = vadd.f32 %v1572_v8, %v587_v5  ;;  %v1549_v11 = vpop.f32.mrb[8].mxu0  ;;  %v1573_v12 = vpop.f32.mrb[8].mxu1 }
 0x138   : > { %v1550_v14 = vpop.f32.mrb[9].mxu0  ;;  %v1574_v16 = vpop.f32.mrb[9].mxu1 }
 0x139   : > { %789 = vst.msk [vmem:[#allocation2 + $0x18] sm:$0xff] %vm499_vm0, %v772_v9  ;;  %797 = vst.msk [vmem:[#allocation2 + $0x58] sm:$0xff] %vm499_vm0, %v780_v10  ;;  %v1551_v17 = vadd.f32 %v1550_v14, %v1549_v11  ;;  %v1575_v18 = vadd.f32 %v1574_v16, %v1573_v12 }
 0x13b   : > { %v773_v19 = vadd.f32 %v1551_v17, %v580_v13  ;;  %v781_v20 = vadd.f32 %v1575_v18, %v588_v15  ;;  %v1552_v21 = vpop.f32.mrb[10].mxu0  ;;  %v1576_v22 = vpop.f32.mrb[10].mxu1 }
 0x13c   : > { %v1553_v24 = vpop.f32.mrb[11].mxu0  ;;  %v1577_v26 = vpop.f32.mrb[11].mxu1 }
 0x13d   : > { %790 = vst.msk [vmem:[#allocation2 + $0x20] sm:$0xff] %vm499_vm0, %v773_v19  ;;  %798 = vst.msk [vmem:[#allocation2 + $0x60] sm:$0xff] %vm499_vm0, %v781_v20  ;;  %v1554_v27 = vadd.f32 %v1553_v24, %v1552_v21  ;;  %v1578_v28 = vadd.f32 %v1577_v26, %v1576_v22 }
 0x13f   : > { %v774_v29 = vadd.f32 %v1554_v27, %v581_v23  ;;  %v782_v30 = vadd.f32 %v1578_v28, %v589_v25  ;;  %v1555_v31 = vpop.f32.mrb[12].mxu0  ;;  %v1579_v32 = vpop.f32.mrb[12].mxu1 }
 0x140   : > { %v1556_v34 = vpop.f32.mrb[13].mxu0  ;;  %v1580_v36 = vpop.f32.mrb[13].mxu1 }
 0x141   : > { %791 = vst.msk [vmem:[#allocation2 + $0x28] sm:$0xff] %vm499_vm0, %v774_v29  ;;  %799 = vst.msk [vmem:[#allocation2 + $0x68] sm:$0xff] %vm499_vm0, %v782_v30  ;;  %v1557_v37 = vadd.f32 %v1556_v34, %v1555_v31  ;;  %v1581_v38 = vadd.f32 %v1580_v36, %v1579_v32 }
 0x143   : > { %v775_v39 = vadd.f32 %v1557_v37, %v582_v33  ;;  %v783_v40 = vadd.f32 %v1581_v38, %v590_v35  ;;  %v1558_v41 = vpop.f32.mrb[14].mxu0  ;;  %v1582_v42 = vpop.f32.mrb[14].mxu1 }
 0x144   : > { %v1559_v44 = vpop.f32.mrb[15].mxu0  ;;  %v1583_v46 = vpop.f32.mrb[15].mxu1 }
 0x145   : > { %792 = vst.msk [vmem:[#allocation2 + $0x30] sm:$0xff] %vm499_vm0, %v775_v39  ;;  %800 = vst.msk [vmem:[#allocation2 + $0x70] sm:$0xff] %vm499_vm0, %v783_v40  ;;  %v1560_v47 = vadd.f32 %v1559_v44, %v1558_v41  ;;  %v1584_v48 = vadd.f32 %v1583_v46, %v1582_v42 }
 0x147   : > { %v776_v49 = vadd.f32 %v1560_v47, %v583_v43  ;;  %v784_v50 = vadd.f32 %v1584_v48, %v591_v45 }
 0x149   : > { %793 = vst.msk [vmem:[#allocation2 + $0x38] sm:$0xff] %vm499_vm0, %v776_v49  ;;  %801 = vst.msk [vmem:[#allocation2 + $0x78] sm:$0xff] %vm499_vm0, %v784_v50 }
 0x14a PF: > { %v841_v51 = vld [vmem:[%s2262_s6] sm:$0xff]  ;;  %v842_v52 = vld [vmem:[%s2262_s6 + $0x8] sm:$0xff]  ;;  %v843_v56 = vld [vmem:[%s2262_s6 + $0x10] sm:$0xff]  ;;  %v1927_v32 = vmov 0.0|0.0   ;;  %vm1928_vm1 = vmmov 0   ;;  %vm1342_vm2 = vcmask 257024  }
 0x14b   : > { %v821_v53 = vld [vmem:[%s2261_s5] sm:$0xff]  ;;  %v1773_v54 = vpack.c.bf16 %v842_v52, %v841_v51  ;;  %v822_v55 = vld [vmem:[%s2261_s5 + $0x8] sm:$0xff]  ;;  %v844_v57 = vld [vmem:[%s2262_s6 + $0x18] sm:$0xff] }
 0x14c   : > { %v1781_v58 = vpack.c.bf16 %v822_v55, %v821_v53  ;;  %v1777_v59 = vpack.c.bf16 %v844_v57, %v843_v56  ;;  %v823_v60 = vld [vmem:[%s2261_s5 + $0x10] sm:$0xff]  ;;  %v824_v61 = vld [vmem:[%s2261_s5 + $0x18] sm:$0xff]  ;;  %v825_v62 = vld [vmem:[#allocation2] sm:$0xff] }
 0x14d   : > { %1774 = vmatprep.subr.bf16.mxu1 %v1773_v54  ;;  %v1785_v63 = vpack.c.bf16 %v824_v61, %v823_v60  ;;  %1650 = vmatprep.mubr.msk.f32.mxu1 %vm499_vm0, %v825_v62  ;;  %v805_v1 = vld [vmem:[%s2056_s30] sm:$0xff]  ;;  %v826_v2 = vld [vmem:[#allocation2 + $0x8] sm:$0xff]  ;;  %v827_v4 = vld [vmem:[#allocation2 + $0x10] sm:$0xff] }
 0x14e   : > { %1782 = vmatprep.subr.bf16.mxu0 %v1781_v58  ;;  %1776 = vmatpush3.bf16.msra.mxu1 %v1773_v54  ;;  %v806_v3 = vld [vmem:[%s2056_s30 + $0x8] sm:$0xff]  ;;  %v807_v5 = vld [vmem:[%s2056_s30 + $0x10] sm:$0xff]  ;;  %v828_v6 = vld [vmem:[#allocation2 + $0x18] sm:$0xff] }
 0x14f   : > { %1784 = vmatpush3.bf16.msra.mxu0 %v1781_v58  ;;  %1778 = vmatprep.subr.bf16.mxu1 %v1777_v59  ;;  %v808_v7 = vld [vmem:[%s2056_s30 + $0x18] sm:$0xff]  ;;  %v829_v8 = vld [vmem:[#allocation2 + $0x20] sm:$0xff]  ;;  %v830_v10 = vld [vmem:[#allocation2 + $0x28] sm:$0xff] }
 0x150   : > { %1786 = vmatprep.subr.bf16.mxu0 %v1785_v63  ;;  %1682 = vmatprep.mubr.msk.f32.mxu0 %vm499_vm0, %v805_v1  ;;  %v809_v9 = vld [vmem:[%s2056_s30 + $0x20] sm:$0xff]  ;;  %v810_v11 = vld [vmem:[%s2056_s30 + $0x28] sm:$0xff]  ;;  %v831_v12 = vld [vmem:[#allocation2 + $0x30] sm:$0xff] }
 0x151   : > { %v811_v13 = vld [vmem:[%s2056_s30 + $0x30] sm:$0xff]  ;;  %v832_v14 = vld [vmem:[#allocation2 + $0x38] sm:$0xff]  ;;  %v833_v16 = vld [vmem:[#allocation2 + $0x40] sm:$0xff] }
 0x152   : > { %1780 = vmatpush3.bf16.msra.mxu1 %v1777_v59  ;;  %v812_v15 = vld [vmem:[%s2056_s30 + $0x38] sm:$0xff]  ;;  %v813_v17 = vld [vmem:[%s2056_s30 + $0x40] sm:$0xff]  ;;  %v834_v18 = vld [vmem:[#allocation2 + $0x48] sm:$0xff] }
 0x153   : > { %1788 = vmatpush3.bf16.msra.mxu0 %v1785_v63  ;;  %v814_v19 = vld [vmem:[%s2056_s30 + $0x48] sm:$0xff]  ;;  %v835_v20 = vld [vmem:[#allocation2 + $0x50] sm:$0xff]  ;;  %v836_v22 = vld [vmem:[#allocation2 + $0x58] sm:$0xff]  ;;  %1789 = vmatprep.subr.bf16.mxu1 %v1927_v32 }
 0x154   : > { %v815_v21 = vld [vmem:[%s2056_s30 + $0x50] sm:$0xff]  ;;  %v816_v23 = vld [vmem:[%s2056_s30 + $0x58] sm:$0xff]  ;;  %v837_v24 = vld [vmem:[#allocation2 + $0x60] sm:$0xff] }
 0x155   : > { %1651 = vmatmul.mubr.msk.f32.vlgmr.msra.gmra.mrb[0].mxu1 %vm499_vm0, %v826_v2  ;;  %v817_v25 = vld [vmem:[%s2056_s30 + $0x60] sm:$0xff]  ;;  %v838_v26 = vld [vmem:[#allocation2 + $0x68] sm:$0xff]  ;;  %v839_v28 = vld [vmem:[#allocation2 + $0x70] sm:$0xff] }
 0x156   : > { %1683 = vmatmul.mubr.msk.f32.vlgmr.msra.gmra.mrb[0].mxu0 %vm499_vm0, %v806_v3  ;;  %1653 = vmatprep.mubr.msk.f32.mxu1 %vm499_vm0, %v827_v4  ;;  %v818_v27 = vld [vmem:[%s2056_s30 + $0x68] sm:$0xff]  ;;  %v819_v29 = vld [vmem:[%s2056_s30 + $0x70] sm:$0xff]  ;;  %v840_v30 = vld [vmem:[#allocation2 + $0x78] sm:$0xff] }
 0x157   : > { %1685 = vmatprep.mubr.msk.f32.mxu0 %vm499_vm0, %v807_v5  ;;  %v820_v31 = vld [vmem:[%s2056_s30 + $0x78] sm:$0xff]  ;;  %v2221_v35 = vld [vmem:[%s2263_s7] ss:$0 sm:$0xff] }
 0x159   : > { %1654 = vmatmul.mubr.msk.f32.gmra.mrb[2].mxu1 %vm499_vm0, %v828_v6 }
 0x15a   : > { %1686 = vmatmul.mubr.msk.f32.gmra.mrb[2].mxu0 %vm499_vm0, %v808_v7  ;;  %1656 = vmatprep.mubr.msk.f32.mxu1 %vm499_vm0, %v829_v8 }
 0x15b   : > { %1688 = vmatprep.mubr.msk.f32.mxu0 %vm499_vm0, %v809_v9 }
 0x15d   : > { %1657 = vmatmul.mubr.msk.f32.gmra.mrb[4].mxu1 %vm499_vm0, %v830_v10 }
 0x15e   : > { %1689 = vmatmul.mubr.msk.f32.gmra.mrb[4].mxu0 %vm499_vm0, %v810_v11  ;;  %1659 = vmatprep.mubr.msk.f32.mxu1 %vm499_vm0, %v831_v12 }
 0x15f   : > { %1691 = vmatprep.mubr.msk.f32.mxu0 %vm499_vm0, %v811_v13 }
 0x161   : > { %1660 = vmatmul.mubr.msk.f32.gmra.mrb[6].mxu1 %vm499_vm0, %v832_v14 }
 0x162   : > { %1692 = vmatmul.mubr.msk.f32.gmra.mrb[6].mxu0 %vm499_vm0, %v812_v15  ;;  %1662 = vmatprep.mubr.msk.f32.mxu1 %vm499_vm0, %v833_v16 }
 0x163   : > { %1694 = vmatprep.mubr.msk.f32.mxu0 %vm499_vm0, %v813_v17 }
 0x165   : > { %1663 = vmatmul.mubr.msk.f32.gmra.mrb[8].mxu1 %vm499_vm0, %v834_v18 }
 0x166   : > { %1695 = vmatmul.mubr.msk.f32.gmra.mrb[8].mxu0 %vm499_vm0, %v814_v19  ;;  %1665 = vmatprep.mubr.msk.f32.mxu1 %vm499_vm0, %v835_v20 }
 0x167   : > { %1697 = vmatprep.mubr.msk.f32.mxu0 %vm499_vm0, %v815_v21 }
 0x169   : > { %1666 = vmatmul.mubr.msk.f32.gmra.mrb[10].mxu1 %vm499_vm0, %v836_v22 }
 0x16a   : > { %1698 = vmatmul.mubr.msk.f32.gmra.mrb[10].mxu0 %vm499_vm0, %v816_v23  ;;  %1668 = vmatprep.mubr.msk.f32.mxu1 %vm499_vm0, %v837_v24 }
 0x16b   : > { %1700 = vmatprep.mubr.msk.f32.mxu0 %vm499_vm0, %v817_v25 }
 0x16d   : > { %1669 = vmatmul.mubr.msk.f32.gmra.mrb[12].mxu1 %vm499_vm0, %v838_v26 }
 0x16e   : > { %1701 = vmatmul.mubr.msk.f32.gmra.mrb[12].mxu0 %vm499_vm0, %v818_v27  ;;  %1671 = vmatprep.mubr.msk.f32.mxu1 %vm499_vm0, %v839_v28 }
 0x16f   : > { %1703 = vmatprep.mubr.msk.f32.mxu0 %vm499_vm0, %v819_v29 }
 0x171   : > { %1672 = vmatmul.mubr.msk.f32.gmra.mrb[14].mxu1 %vm499_vm0, %v840_v30 }
 0x172   : > { %1704 = vmatmul.mubr.msk.f32.gmra.mrb[14].mxu0 %vm499_vm0, %v820_v31  ;;  %1738 = vmatprep.mubr.msk.f32.mxu1 %vm1928_vm1, %v1926_v0 }
 0x228   : > { %v1652_v33 = vpop.f32.mrb[0].mxu1 }
 0x229   : > { %v1684_v34 = vpop.f32.mrb[0].mxu0  ;;  %v960_v36 = vpop.f32.mrb[1].mxu1 }
 0x22a   : > { %v1159_v37 = vadd.f32 %v1684_v34, %v1652_v33  ;;  %v1153_v38 = vpop.f32.mrb[1].mxu0 }
 0x22b   : > { %v1154_v39 = vadd.f32 %v1153_v38, %v960_v36 }
 0x22c   : > { %v1240_v40 = vadd.f32 %v2221_v35, %v1159_v37  ;;  %v1655_v41 = vpop.f32.mrb[2].mxu1 }
 0x22d   : > { %v1239_v42 = vadd.f32 %v2221_v35, %v1154_v39  ;;  %v1687_v43 = vpop.f32.mrb[2].mxu0  ;;  %v970_v44 = vpop.f32.mrb[3].mxu1 }
 0x22e   : > { %v1256_v45 = vmax.f32 %v1240_v40, 0.0  ;;  %v1169_v0 = vadd.f32 %v1687_v43, %v1655_v41  ;;  %v1163_v46 = vpop.f32.mrb[3].mxu0 }
 0x22f   : > { %v1255_v47 = vmax.f32 %v1239_v42, 0.0  ;;  %v1164_v48 = vadd.f32 %v1163_v46, %v970_v44 }
 0x230   : > { %v1242_v49 = vadd.f32 %v2221_v35, %v1169_v0  ;;  %v1658_v50 = vpop.f32.mrb[4].mxu1 }
 0x231   : > { %v1790_v51 = vpack.c.bf16 %v1256_v45, %v1255_v47  ;;  %v1241_v52 = vadd.f32 %v2221_v35, %v1164_v48  ;;  %v1690_v53 = vpop.f32.mrb[4].mxu0  ;;  %v980_v54 = vpop.f32.mrb[5].mxu1 }
 0x232   : > { %v1258_v55 = vmax.f32 %v1242_v49, 0.0  ;;  %v1179_v56 = vadd.f32 %v1690_v53, %v1658_v50  ;;  %v1173_v57 = vpop.f32.mrb[5].mxu0 }
 0x233   : > { %v1257_v58 = vmax.f32 %v1241_v52, 0.0  ;;  %v1174_v59 = vadd.f32 %v1173_v57, %v980_v54  ;;  %1791 = vmatpush3.bf16.msra.mxu1 %v1790_v51 }
 0x234   : > { %v1244_v60 = vadd.f32 %v2221_v35, %v1179_v56  ;;  %v1661_v61 = vpop.f32.mrb[6].mxu1  ;;  %1792 = vmatprep.subr.bf16.mxu1 %v1927_v32 }
 0x235   : > { %v1793_v62 = vpack.c.bf16 %v1258_v55, %v1257_v58  ;;  %v1243_v63 = vadd.f32 %v2221_v35, %v1174_v59  ;;  %v1693_v1 = vpop.f32.mrb[6].mxu0  ;;  %v990_v2 = vpop.f32.mrb[7].mxu1  ;;  %v1271_v59 = vld [vmem:[%s2062_s14] sm:$0xf] }
 0x236   : > { %v1260_v3 = vmax.f32 %v1244_v60, 0.0  ;;  %v1189_v4 = vadd.f32 %v1693_v1, %v1661_v61  ;;  %v1183_v5 = vpop.f32.mrb[7].mxu0 }
 0x237   : > { %v1259_v6 = vmax.f32 %v1243_v63, 0.0  ;;  %v1184_v7 = vadd.f32 %v1183_v5, %v990_v2  ;;  %1794 = vmatpush3.bf16.msra.mxu1 %v1793_v62 }
 0x238   : > { %v1246_v8 = vadd.f32 %v2221_v35, %v1189_v4  ;;  %v1664_v9 = vpop.f32.mrb[8].mxu1  ;;  %1795 = vmatprep.subr.bf16.mxu1 %v1927_v32 }
 0x239   : > { %v1796_v10 = vpack.c.bf16 %v1260_v3, %v1259_v6  ;;  %v1245_v11 = vadd.f32 %v2221_v35, %v1184_v7  ;;  %v1696_v12 = vpop.f32.mrb[8].mxu0  ;;  %v1000_v13 = vpop.f32.mrb[9].mxu1 }
 0x23a   : > { %v1262_v14 = vmax.f32 %v1246_v8, 0.0  ;;  %v1199_v15 = vadd.f32 %v1696_v12, %v1664_v9  ;;  %v1193_v16 = vpop.f32.mrb[9].mxu0 }
 0x23b   : > { %v1261_v17 = vmax.f32 %v1245_v11, 0.0  ;;  %v1194_v18 = vadd.f32 %v1193_v16, %v1000_v13  ;;  %1797 = vmatpush3.bf16.msra.mxu1 %v1796_v10 }
 0x23c   : > { %v1248_v19 = vadd.f32 %v2221_v35, %v1199_v15  ;;  %v1667_v20 = vpop.f32.mrb[10].mxu1  ;;  %1798 = vmatprep.subr.bf16.mxu1 %v1927_v32 }
 0x23d   : > { %v1799_v21 = vpack.c.bf16 %v1262_v14, %v1261_v17  ;;  %v1247_v22 = vadd.f32 %v2221_v35, %v1194_v18  ;;  %v1699_v23 = vpop.f32.mrb[10].mxu0  ;;  %v1010_v24 = vpop.f32.mrb[11].mxu1 }
 0x23e   : > { %v1264_v25 = vmax.f32 %v1248_v19, 0.0  ;;  %v1209_v26 = vadd.f32 %v1699_v23, %v1667_v20  ;;  %v1203_v27 = vpop.f32.mrb[11].mxu0 }
 0x23f   : > { %v1263_v28 = vmax.f32 %v1247_v22, 0.0  ;;  %v1204_v29 = vadd.f32 %v1203_v27, %v1010_v24  ;;  %1800 = vmatpush3.bf16.msra.mxu1 %v1799_v21 }
 0x240   : > { %v1250_v30 = vadd.f32 %v2221_v35, %v1209_v26  ;;  %v1670_v31 = vpop.f32.mrb[12].mxu1  ;;  %1801 = vmatprep.subr.bf16.mxu1 %v1927_v32 }
 0x241   : > { %v1802_v33 = vpack.c.bf16 %v1264_v25, %v1263_v28  ;;  %v1249_v34 = vadd.f32 %v2221_v35, %v1204_v29  ;;  %v1702_v36 = vpop.f32.mrb[12].mxu0  ;;  %v1020_v37 = vpop.f32.mrb[13].mxu1 }
 0x242   : > { %v1266_v38 = vmax.f32 %v1250_v30, 0.0  ;;  %v1219_v39 = vadd.f32 %v1702_v36, %v1670_v31  ;;  %v1213_v40 = vpop.f32.mrb[13].mxu0 }
 0x243   : > { %v1265_v41 = vmax.f32 %v1249_v34, 0.0  ;;  %v1214_v42 = vadd.f32 %v1213_v40, %v1020_v37  ;;  %1803 = vmatpush3.bf16.msra.mxu1 %v1802_v33 }
 0x244   : > { %v1252_v43 = vadd.f32 %v2221_v35, %v1219_v39  ;;  %v1673_v44 = vpop.f32.mrb[14].mxu1  ;;  %1804 = vmatprep.subr.bf16.mxu1 %v1927_v32 }
 0x245   : > { %v1805_v45 = vpack.c.bf16 %v1266_v38, %v1265_v41  ;;  %v1251_v0 = vadd.f32 %v2221_v35, %v1214_v42  ;;  %v1705_v46 = vpop.f32.mrb[14].mxu0  ;;  %v1030_v47 = vpop.f32.mrb[15].mxu1 }
 0x246   : > { %v1268_v48 = vmax.f32 %v1252_v43, 0.0  ;;  %v1229_v49 = vadd.f32 %v1705_v46, %v1673_v44  ;;  %v1223_v50 = vpop.f32.mrb[15].mxu0 }
 0x247   : > { %v1267_v51 = vmax.f32 %v1251_v0, 0.0  ;;  %v1224_v52 = vadd.f32 %v1223_v50, %v1030_v47  ;;  %1806 = vmatpush3.bf16.msra.mxu1 %v1805_v45 }
 0x248   : > { %v1254_v53 = vadd.f32 %v2221_v35, %v1229_v49  ;;  %1807 = vmatprep.subr.bf16.mxu1 %v1927_v32 }
 0x249   : > { %v1808_v54 = vpack.c.bf16 %v1268_v48, %v1267_v51  ;;  %v1253_v55 = vadd.f32 %v2221_v35, %v1224_v52 }
 0x24a   : > { %v1270_v56 = vmax.f32 %v1254_v53, 0.0 }
 0x24b   : > { %v1269_v57 = vmax.f32 %v1253_v55, 0.0  ;;  %1809 = vmatpush3.bf16.msra.mxu1 %v1808_v54 }
 0x24c   : > { %1810 = vmatprep.subr.bf16.mxu1 %v1927_v32 }
 0x24d   : > { %v1811_v58 = vpack.c.bf16 %v1270_v56, %v1269_v57 }
 0x24f   : > { %1812 = vmatpush3.bf16.msra.mxu1 %v1811_v58 }
 0x252   : > { %1739 = vmatmul.mubr.f32.vlgmr.msra.gmra.mrb[16].mxu1 %v1271_v59 }
 0x325   : > { %v1338_v60 = vpop.f32.mrb[16].mxu1 }
 0x326   : > { %1343 = vst.msk [vmem:[%s2067_s0] sm:$0xf] %vm1342_vm2, %v1338_v60  ;;  %v1740_v61 = vpop.f32.mrb[17].mxu1 }
 0x327 PF: > { %s29_s19 = sadd.s32 1, %s1922_s19   ;;  %s2268_s1 = smov %s1918_s18 }
 0x328   : > { %p26_p5 = scmp.ge.s32.totalorder %s29_s19, 4   ;;  %s2269_s18 = smov %s2271_s20 }
 0x32a   :  { %28 = sbr.rel (!%p26_p5) target bundleno = 27 (0x1b), region = 99 }

</bundles_post_ra>
